<compile_context>
chip_gen: v6e
topology: v6e:2x2x1
jax: 0.10.0
libtpu: 0.0.40
codegen_flags: <defaults>
</compile_context>

<pallas_src>
import functools

import jax
import jax.numpy as jnp
from jax import lax
from jax.experimental import pallas as pl
from jax.experimental.pallas import tpu as pltpu

_VMEM_LIMIT = 32 * 1024 * 1024  # raised scoped-VMEM cap, safe on v5e/v6e/v7x


def _pick_tile(n, candidates=(256, 512, 128)):
    for c in candidates:
        if n % c == 0:
            return c
    return n


# ----------------------------- Pallas kernels -----------------------------

def rmsnorm_gemm_bias_kernel(x_ref, g_ref, w_ref, b_ref, o_ref, *, eps):
    """Fused RMSNorm -> GEMM + bias (used for the fused QKV projection)."""
    x = x_ref[...].astype(jnp.float32)                       # (TM, H)
    inv = lax.rsqrt(jnp.mean(x * x, axis=-1, keepdims=True) + eps)
    xn = (x * inv * g_ref[...].astype(jnp.float32)).astype(jnp.bfloat16)
    acc = jnp.dot(xn, w_ref[...], preferred_element_type=jnp.float32)
    o_ref[...] = (acc + b_ref[...].astype(jnp.float32)).astype(o_ref.dtype)


def gemm_residual_kernel(x_ref, w_ref, r_ref, o_ref):
    """o_proj: y = x @ W (no bias) + residual, fused epilogue."""
    acc = jnp.dot(x_ref[...], w_ref[...], preferred_element_type=jnp.float32)
    o_ref[...] = (acc + r_ref[...].astype(jnp.float32)).astype(o_ref.dtype)


def rmsnorm_swiglu_residual_kernel(x_ref, g_ref, wg_ref, wu_ref, wd_ref, o_ref,
                                   xn_sc, acc_sc, *, eps):
    """Fused RMSNorm -> SwiGLU MLP -> +residual; F (inter) axis tiled/accumulated."""
    fi = pl.program_id(1)

    @pl.when(fi == 0)
    def _():
        x = x_ref[...].astype(jnp.float32)
        inv = lax.rsqrt(jnp.mean(x * x, axis=-1, keepdims=True) + eps)
        xn_sc[...] = (x * inv * g_ref[...].astype(jnp.float32)).astype(jnp.bfloat16)
        acc_sc[...] = jnp.zeros_like(acc_sc)

    xn = xn_sc[...]
    gate = jnp.dot(xn, wg_ref[...], preferred_element_type=jnp.float32)
    up = jnp.dot(xn, wu_ref[...], preferred_element_type=jnp.float32)
    hmid = (jax.nn.silu(gate) * up).astype(jnp.bfloat16)
    acc_sc[...] += jnp.dot(hmid, wd_ref[...], preferred_element_type=jnp.float32)

    @pl.when(fi == pl.num_programs(1) - 1)
    def _():
        o_ref[...] = (acc_sc[...] + x_ref[...].astype(jnp.float32)).astype(o_ref.dtype)


def attn_kernel(q_ref, k_ref, v_ref, mask_ref, cos_q_ref, sin_q_ref,
                cos_k_ref, sin_k_ref, o_ref,
                qrot_sc, m_sc, l_sc, acc_sc, *, scale):
    """Flash-style (online-softmax) causal+padding GQA attention with in-kernel RoPE.

    grid = (B, Hkv, num_kv_tiles). The whole GQA group of q heads sharing one
    kv head is handled inside the kernel, so K/V are loaded + RoPE'd only once.
    """
    ki = pl.program_id(2)
    d = q_ref.shape[-1]
    t = q_ref.shape[2]
    tk = k_ref.shape[2]
    half = d // 2

    @pl.when(ki == 0)
    def _():
        q = q_ref[0].astype(jnp.float32)                      # (G, T, D)
        qr = q * cos_q_ref[...] + pltpu.roll(q, shift=half, axis=2) * sin_q_ref[...]
        qrot_sc[...] = qr.astype(jnp.bfloat16)
        m_sc[...] = jnp.full_like(m_sc, -1e30)
        l_sc[...] = jnp.zeros_like(l_sc)
        acc_sc[...] = jnp.zeros_like(acc_sc)

    k = k_ref[0, 0].astype(jnp.float32)                       # (TK, D)
    kr = (k * cos_k_ref[...] +
          pltpu.roll(k, shift=half, axis=1) * sin_k_ref[...]).astype(jnp.bfloat16)
    v = v_ref[0, 0].astype(jnp.bfloat16)                      # (TK, D)

    row = lax.broadcasted_iota(jnp.int32, (t, tk), 0)              # query position
    col = lax.broadcasted_iota(jnp.int32, (t, tk), 1) + ki * tk    # key position
    key_valid = mask_ref[0] > 0                                    # (1, TK)
    valid = (col <= row) & key_valid                               # causal & padding

    group = qrot_sc.shape[0]
    for gi in range(group):                                        # static GQA unroll
        s = jnp.einsum('qd,kd->qk', qrot_sc[gi], kr,
                       preferred_element_type=jnp.float32) * scale
        s = jnp.where(valid, s, -1e30)
        m_prev = m_sc[gi]                                          # (T, 1)
        m_new = jnp.maximum(m_prev, jnp.max(s, axis=-1, keepdims=True))
        alpha = jnp.exp(m_prev - m_new)
        p = jnp.where(valid, jnp.exp(s - m_new), 0.0)
        l_sc[gi] = alpha * l_sc[gi] + jnp.sum(p, axis=-1, keepdims=True)
        acc_sc[gi] = alpha * acc_sc[gi] + jnp.dot(
            p.astype(jnp.bfloat16), v, preferred_element_type=jnp.float32)
        m_sc[gi] = m_new

    @pl.when(ki == pl.num_programs(2) - 1)
    def _():
        inv_l = pl.reciprocal(jnp.maximum(l_sc[...], 1e-30), approx=True)
        o_ref[0] = (acc_sc[...] * inv_l).astype(o_ref.dtype)


def final_norm_kernel(x_ref, wr_ref, g_ref, b_ref, o_ref, *, eps, ln_eps):
    """Fused final Qwen RMSNorm (hidden_states[-1]) + the module's hidden_norm LayerNorm."""
    x = x_ref[...].astype(jnp.float32)
    inv = lax.rsqrt(jnp.mean(x * x, axis=-1, keepdims=True) + eps)
    y = x * inv * wr_ref[...].astype(jnp.float32)
    mu = jnp.mean(y, axis=-1, keepdims=True)
    var = jnp.mean((y - mu) * (y - mu), axis=-1, keepdims=True)
    z = (y - mu) * lax.rsqrt(var + ln_eps)
    o_ref[...] = (z * g_ref[...] + b_ref[...]).astype(o_ref.dtype)


# ------------------------------ thin wrappers ------------------------------

def rmsnorm_gemm_bias(x, gamma, w, b, eps, out_dtype=jnp.bfloat16):
    m, h = x.shape
    n = w.shape[1]
    tm = _pick_tile(m)
    return pl.pallas_call(
        functools.partial(rmsnorm_gemm_bias_kernel, eps=eps),
        out_shape=jax.ShapeDtypeStruct((m, n), out_dtype),
        grid=(m // tm,),
        in_specs=[pl.BlockSpec((tm, h), lambda i: (i, 0)),
                  pl.BlockSpec((1, h), lambda i: (0, 0)),
                  pl.BlockSpec((h, n), lambda i: (0, 0)),
                  pl.BlockSpec((1, n), lambda i: (0, 0))],
        out_specs=pl.BlockSpec((tm, n), lambda i: (i, 0)),
        compiler_params=pltpu.CompilerParams(
            dimension_semantics=("parallel",), vmem_limit_bytes=_VMEM_LIMIT),
    )(x, gamma.reshape(1, h), w, b.reshape(1, n))


def gemm_residual(x, w, resid):
    m, k = x.shape
    n = w.shape[1]
    tm = _pick_tile(m)
    return pl.pallas_call(
        gemm_residual_kernel,
        out_shape=jax.ShapeDtypeStruct((m, n), resid.dtype),
        grid=(m // tm,),
        in_specs=[pl.BlockSpec((tm, k), lambda i: (i, 0)),
                  pl.BlockSpec((k, n), lambda i: (0, 0)),
                  pl.BlockSpec((tm, n), lambda i: (i, 0))],
        out_specs=pl.BlockSpec((tm, n), lambda i: (i, 0)),
        compiler_params=pltpu.CompilerParams(
            dimension_semantics=("parallel",), vmem_limit_bytes=_VMEM_LIMIT),
    )(x, w, resid)


def rmsnorm_swiglu_residual(x, gamma, wg, wu, wd, eps):
    m, h = x.shape
    f = wg.shape[1]
    tm = _pick_tile(m)
    tf = _pick_tile(f)
    return pl.pallas_call(
        functools.partial(rmsnorm_swiglu_residual_kernel, eps=eps),
        out_shape=jax.ShapeDtypeStruct((m, h), x.dtype),
        grid=(m // tm, f // tf),
        in_specs=[pl.BlockSpec((tm, h), lambda i, fi: (i, 0)),
                  pl.BlockSpec((1, h), lambda i, fi: (0, 0)),
                  pl.BlockSpec((h, tf), lambda i, fi: (0, fi)),
                  pl.BlockSpec((h, tf), lambda i, fi: (0, fi)),
                  pl.BlockSpec((tf, h), lambda i, fi: (fi, 0))],
        out_specs=pl.BlockSpec((tm, h), lambda i, fi: (i, 0)),
        scratch_shapes=[pltpu.VMEM((tm, h), jnp.bfloat16),
                        pltpu.VMEM((tm, h), jnp.float32)],
        compiler_params=pltpu.CompilerParams(
            dimension_semantics=("parallel", "arbitrary"),
            vmem_limit_bytes=_VMEM_LIMIT),
    )(x, gamma.reshape(1, h), wg, wu, wd)


def attention(q, k, v, mask, cos, sin_signed, scale):
    b, hq, t, d = q.shape
    hkv = k.shape[1]
    g = hq // hkv
    tk = 128 if t % 128 == 0 else t          # KV tile for online softmax
    mask3 = mask.reshape(b, 1, t)
    return pl.pallas_call(
        functools.partial(attn_kernel, scale=scale),
        out_shape=jax.ShapeDtypeStruct((b, hq, t, d), q.dtype),
        grid=(b, hkv, t // tk),
        in_specs=[
            pl.BlockSpec((1, g, t, d), lambda bi, hi, ki: (bi, hi, 0, 0)),
            pl.BlockSpec((1, 1, tk, d), lambda bi, hi, ki: (bi, hi, ki, 0)),
            pl.BlockSpec((1, 1, tk, d), lambda bi, hi, ki: (bi, hi, ki, 0)),
            pl.BlockSpec((1, 1, tk), lambda bi, hi, ki: (bi, 0, ki)),
            pl.BlockSpec((t, d), lambda bi, hi, ki: (0, 0)),
            pl.BlockSpec((t, d), lambda bi, hi, ki: (0, 0)),
            pl.BlockSpec((tk, d), lambda bi, hi, ki: (ki, 0)),
            pl.BlockSpec((tk, d), lambda bi, hi, ki: (ki, 0)),
        ],
        out_specs=pl.BlockSpec((1, g, t, d), lambda bi, hi, ki: (bi, hi, 0, 0)),
        scratch_shapes=[pltpu.VMEM((g, t, d), jnp.bfloat16),
                        pltpu.VMEM((g, t, 1), jnp.float32),
                        pltpu.VMEM((g, t, 1), jnp.float32),
                        pltpu.VMEM((g, t, d), jnp.float32)],
        compiler_params=pltpu.CompilerParams(
            dimension_semantics=("parallel", "parallel", "arbitrary"),
            vmem_limit_bytes=_VMEM_LIMIT),
    )(q, k, v, mask3, cos, sin_signed, cos, sin_signed)


def final_norms(x, w_rms, gamma, beta, eps, ln_eps):
    m, h = x.shape
    tm = _pick_tile(m)
    return pl.pallas_call(
        functools.partial(final_norm_kernel, eps=eps, ln_eps=ln_eps),
        out_shape=jax.ShapeDtypeStruct((m, h), x.dtype),
        grid=(m // tm,),
        in_specs=[pl.BlockSpec((tm, h), lambda i: (i, 0)),
                  pl.BlockSpec((1, h), lambda i: (0, 0)),
                  pl.BlockSpec((1, h), lambda i: (0, 0)),
                  pl.BlockSpec((1, h), lambda i: (0, 0))],
        out_specs=pl.BlockSpec((tm, h), lambda i: (i, 0)),
        compiler_params=pltpu.CompilerParams(
            dimension_semantics=("parallel",), vmem_limit_bytes=_VMEM_LIMIT),
    )(x, w_rms.reshape(1, h), gamma.reshape(1, h), beta.reshape(1, h))


# ------------------------------ model glue ---------------------------------

def init_params(key, cfg):
    h, d = cfg["hidden"], cfg["head_dim"]
    hq, hkv, f = cfg["n_heads"], cfg["n_kv_heads"], cfg["inter"]
    n_qkv = (hq + 2 * hkv) * d

    def nrm(k_, shape, scale=0.02, dtype=jnp.float32):
        return (scale * jax.random.normal(k_, shape, dtype=jnp.float32)).astype(dtype)

    keys = jax.random.split(key, cfg["n_layers"] + 1)
    layers = []
    for lk in keys[:-1]:
        ks = jax.random.split(lk, 6)
        layers.append(dict(
            ln1_w=jnp.ones((h,), jnp.float32),
            wqkv=nrm(ks[0], (h, n_qkv), dtype=jnp.bfloat16),     # Wq|Wk|Wv fused
            bqkv=nrm(ks[1], (n_qkv,)),
            wo=nrm(ks[2], (hq * d, h), dtype=jnp.bfloat16),
            ln2_w=jnp.ones((h,), jnp.float32),
            wg=nrm(ks[3], (h, f), dtype=jnp.bfloat16),
            wu=nrm(ks[4], (h, f), dtype=jnp.bfloat16),
            wd=nrm(ks[5], (f, h), dtype=jnp.bfloat16),
        ))
    embed = nrm(keys[-1], (cfg["vocab"], h))
    return dict(layers=layers, embed=embed,
                ln_f_w=jnp.ones((h,), jnp.float32),
                hn_gamma=jnp.ones((h,), jnp.float32),
                hn_beta=jnp.zeros((h,), jnp.float32))


def qwen_encoder_forward(input_ids, ilens, params, cfg):
    b, t = input_ids.shape
    h = cfg["hidden"]
    hq, hkv, d = cfg["n_heads"], cfg["n_kv_heads"], cfg["head_dim"]
    eps = cfg["eps"]
    bt = b * t

    # torch.clamp(input_ids, min=0) + embedding lookup (plain-JAX gather).
    ids = jnp.maximum(input_ids, 0)
    hid2d = jnp.take(params["embed"], ids.reshape(-1), axis=0)      # (B*T, H) f32

    # make_pad_mask -> input_masks (1 = valid token, 0 = padding)
    input_masks = (jnp.arange(t)[None, :] < ilens[:, None]).astype(jnp.int32)

    # RoPE tables (sin has the rotate_half sign folded in: [-sin, +sin]).
    inv_freq = 1.0 / (cfg["rope_theta"] **
                      (jnp.arange(0, d, 2, dtype=jnp.float32) / d))
    pos = jnp.arange(t, dtype=jnp.float32)
    freqs = pos[:, None] * inv_freq[None, :]                        # (T, D/2)
    emb = jnp.concatenate([freqs, freqs], axis=-1)                  # (T, D)
    cos = jnp.cos(emb)
    sign = jnp.concatenate([-jnp.ones(d // 2), jnp.ones(d // 2)])
    sin_signed = jnp.sin(emb) * sign[None, :]

    scale = 1.0 / (d ** 0.5)

    for lp in params["layers"]:
        # --- self-attention block: RMSNorm fused into the fused QKV GEMM ---
        qkv = rmsnorm_gemm_bias(hid2d, lp["ln1_w"], lp["wqkv"], lp["bqkv"], eps)
        q = qkv[:, :hq * d].reshape(b, t, hq, d).transpose(0, 2, 1, 3)
        k = qkv[:, hq * d:(hq + hkv) * d].reshape(b, t, hkv, d).transpose(0, 2, 1, 3)
        v = qkv[:, (hq + hkv) * d:].reshape(b, t, hkv, d).transpose(0, 2, 1, 3)
        attn = attention(q, k, v, input_masks, cos, sin_signed, scale)
        attn2d = attn.transpose(0, 2, 1, 3).reshape(bt, hq * d)
        hid2d = gemm_residual(attn2d, lp["wo"], hid2d)              # residual fused

        # --- MLP block: RMSNorm + SwiGLU + residual fused, F tiled ---
        hid2d = rmsnorm_swiglu_residual(hid2d, lp["ln2_w"],
                                        lp["wg"], lp["wu"], lp["wd"], eps)

    # final Qwen RMSNorm (== hidden_states[-1]) + the module's hidden_norm LayerNorm
    out2d = final_norms(hid2d, params["ln_f_w"], params["hn_gamma"],
                        params["hn_beta"], eps, cfg["ln_eps"])
    return out2d.reshape(b, t, h), ilens


# --------------------------------- main -------------------------------------

if __name__ == "__main__":
    cfg = dict(hidden=256, head_dim=128, n_heads=2, n_kv_heads=1, inter=512,
               n_layers=2, vocab=512, rope_theta=1e6, eps=1e-6, ln_eps=1e-5)

    key = jax.random.PRNGKey(0)
    kp, kx = jax.random.split(key)
    params = init_params(kp, cfg)

    B, T = 2, 256
    input_ids = jax.random.randint(kx, (B, T), 0, cfg["vocab"], dtype=jnp.int32)
    ilens = jnp.array([256, 173], dtype=jnp.int32)

    outs, out_lens = qwen_encoder_forward(input_ids, ilens, params, cfg)
    jax.block_until_ready((outs, out_lens))

    assert outs.shape == (B, T, cfg["hidden"])
    assert out_lens.shape == (B,)
    assert bool(jnp.all(jnp.isfinite(outs)))
    print("KERNEL_OK")
</pallas_src>

<mosaic_0001>
module attributes {stable_mosaic.version = 11 : i64} {
  func.func @rmsnorm_gemm_bias_kernel(%arg0: i32, %arg1: memref<256x256xf32, #tpu.memory_space<vmem>>, %arg2: memref<1x256xf32, #tpu.memory_space<vmem>>, %arg3: memref<256x512xbf16, #tpu.memory_space<vmem>>, %arg4: memref<1x512xf32, #tpu.memory_space<vmem>>, %arg5: memref<256x512xbf16, #tpu.memory_space<vmem>>) attributes {dimension_semantics = [#tpu.dimension_semantics<parallel>], iteration_bounds = array<i64: 2>, scalar_prefetch = 0 : i64, scratch_operands = 0 : i64, tpu.core_type = #tpu.core_type<tc>, window_params = [{transform_indices = @transform_0, window_bounds = array<i64: 256, 256>}, {pipeline_mode = #tpu.pipeline_mode<synchronous>, transform_indices = @transform_1, window_bounds = array<i64: 1, 256>}, {pipeline_mode = #tpu.pipeline_mode<synchronous>, transform_indices = @transform_2, window_bounds = array<i64: 256, 512>}, {pipeline_mode = #tpu.pipeline_mode<synchronous>, transform_indices = @transform_3, window_bounds = array<i64: 1, 512>}, {transform_indices = @transform_4, window_bounds = array<i64: 256, 512>}]} {
    %c0 = arith.constant 0 : index
    %c0_0 = arith.constant 0 : index
    %0 = vector.load %arg1[%c0, %c0_0] : memref<256x256xf32, #tpu.memory_space<vmem>>, vector<256x256xf32>
    %1 = arith.mulf %0, %0 : vector<256x256xf32>
    %cst = arith.constant dense<0.000000e+00> : vector<256xf32>
    %2 = vector.multi_reduction <add>, %1, %cst [1] : vector<256x256xf32> to vector<256xf32>
    %3 = vector.shape_cast %2 : vector<256xf32> to vector<256x1xf32>
    %cst_1 = arith.constant 2.560000e+02 : f32
    %4 = vector.broadcast %cst_1 : f32 to vector<256x1xf32>
    %5 = arith.divf %3, %4 : vector<256x1xf32>
    %cst_2 = arith.constant 9.99999997E-7 : f32
    %6 = vector.broadcast %cst_2 : f32 to vector<256x1xf32>
    %7 = arith.addf %5, %6 : vector<256x1xf32>
    %8 = math.rsqrt %7 : vector<256x1xf32>
    %9 = vector.broadcast %8 : vector<256x1xf32> to vector<256x256xf32>
    %10 = arith.mulf %0, %9 : vector<256x256xf32>
    %c0_3 = arith.constant 0 : index
    %c0_4 = arith.constant 0 : index
    %11 = vector.load %arg2[%c0_3, %c0_4] : memref<1x256xf32, #tpu.memory_space<vmem>>, vector<1x256xf32>
    %12 = vector.broadcast %11 : vector<1x256xf32> to vector<256x256xf32>
    %13 = arith.mulf %10, %12 : vector<256x256xf32>
    %14 = arith.truncf %13 : vector<256x256xf32> to vector<256x256xbf16>
    %c0_5 = arith.constant 0 : index
    %c0_6 = arith.constant 0 : index
    %15 = vector.load %arg3[%c0_5, %c0_6] : memref<256x512xbf16, #tpu.memory_space<vmem>>, vector<256x512xbf16>
    %cst_7 = arith.constant dense<0.000000e+00> : vector<256x512xf32>
    %16 = tpu.matmul %14, %15, %cst_7 {dimension_numbers = #tpu.dot_dimension_numbers<[1], [0], [0], [1], [0, 0, 1, 1], [], []>} : vector<256x256xbf16>, vector<256x512xbf16>, vector<256x512xf32> -> vector<256x512xf32>
    %c0_8 = arith.constant 0 : index
    %c0_9 = arith.constant 0 : index
    %17 = vector.load %arg4[%c0_8, %c0_9] : memref<1x512xf32, #tpu.memory_space<vmem>>, vector<1x512xf32>
    %18 = vector.broadcast %17 : vector<1x512xf32> to vector<256x512xf32>
    %19 = arith.addf %16, %18 : vector<256x512xf32>
    %20 = arith.truncf %19 : vector<256x512xf32> to vector<256x512xbf16>
    %c0_10 = arith.constant 0 : index
    %c0_11 = arith.constant 0 : index
    %21 = vector.load %arg5[%c0_10, %c0_11] : memref<256x512xbf16, #tpu.memory_space<vmem>>, vector<256x512xbf16>
    tpu.vector_store %arg5[%c0_10, %c0_11], %20 {strides = array<i32>} : memref<256x512xbf16, #tpu.memory_space<vmem>>, vector<256x512xbf16>,
    return
  }
  func.func @transform_0(%arg0: i32) -> (i32, i32) {
    %c0_i32 = arith.constant 0 : i32
    %c0_i32_0 = arith.constant 0 : i32
    return %arg0, %c0_i32 : i32, i32
  }
  func.func @transform_1(%arg0: i32) -> (i32, i32) {
    %c0_i32 = arith.constant 0 : i32
    %c0_i32_0 = arith.constant 0 : i32
    %c0_i32_1 = arith.constant 0 : i32
    return %c0_i32, %c0_i32_0 : i32, i32
  }
  func.func @transform_2(%arg0: i32) -> (i32, i32) {
    %c0_i32 = arith.constant 0 : i32
    %c0_i32_0 = arith.constant 0 : i32
    %c0_i32_1 = arith.constant 0 : i32
    return %c0_i32, %c0_i32_0 : i32, i32
  }
  func.func @transform_3(%arg0: i32) -> (i32, i32) {
    %c0_i32 = arith.constant 0 : i32
    %c0_i32_0 = arith.constant 0 : i32
    %c0_i32_1 = arith.constant 0 : i32
    return %c0_i32, %c0_i32_0 : i32, i32
  }
  func.func @transform_4(%arg0: i32) -> (i32, i32) {
    %c0_i32 = arith.constant 0 : i32
    %c0_i32_0 = arith.constant 0 : i32
    return %arg0, %c0_i32 : i32, i32
  }
}

</mosaic_0001>

<bundles_post_ra>
// kernel: tpu_custom_call.1
= control target key start
LH: loop header
LB: loop body
LE: loop exit
PB: predicated region body
PF: predicated region fallthrough
CT: control target
= control target key end

     0   :  { %s3574_s0 = inlined_call_operand.hbm [shape: f32[512,256], index: 0, kind: input, shape index: {}]   ;;  %s3575_s1 = inlined_call_operand.hbm [shape: f32[1,256], index: 1, kind: input, shape index: {}]   ;;  %s3576_s2 = inlined_call_operand.hbm [shape: bf16[256,512], index: 2, kind: input, shape index: {}]   ;;  %s3577_s3 = inlined_call_operand.vmem [shape: f32[1,512], index: 3, kind: input, shape index: {}]   ;;  %s3578_s4 = inlined_call_operand.hbm [shape: bf16[512,512], index: 4, kind: output, shape index: {}]  }
   0x1   :  { %3602 = sst [smem:[#allocation28_spill]] %s3575_s1 }
   0x2   :  { %9 = vsyncpa [#allocation3], 0 }
   0x3   :  { %11 = vsyncpa [#allocation3 + $0x1], 0 }
   0x4   :  { %12 = vsyncpa [#allocation6], 0 }
   0x5   :  { %13 = vsyncpa [#allocation4], 0 }
   0x6   :  { %15 = vsyncpa [#allocation4 + $0x1], 0  ;;  %s2722_s15 = smov 0   ;;  %s2724_s16 = smov 0  }
   0x7   :  { %s2726_s17 = smov 0   ;;  %s2728_s18 = smov 0  }
   0x8 LB: > { %s2743_s19 = sadd.s32 4294967295, %s2687_s18   ;;  %s2086_s20 = sadd.s32 4294967294, %s2687_s18   ;;  %s2687_s18 = sphi %s2728_s18, %s3656_s18   ;;  %s2683_s17 = sphi %s2726_s17, %s3655_s17   ;;  %s2679_s16 = sphi %s2724_s16, %s3654_s16   ;;  %s2675_s15 = sphi %s2722_s15, %s3653_s15  }
   0x9   : > { %s2747_s21 = sadd.s32 1, %s2687_s18   ;;  %s28_s22 = sadd.s32 1, %s2683_s17 }
   0xa   : > { %s25_s23 = ssub.s32 %s2687_s18, %s2747_s21  ;;  %p35_p0 = scmp.ne.s32.totalorder %s2683_s17, %s2679_s16 }
   0xb   : > { %p26_p1 = scmp.eq.s32.totalorder %s25_s23, 0  ;;  %p36_p2 = scmp.eq.s32.totalorder %s2687_s18, 0 }
   0xc   : > { %p41_p3 = scmp.ne.s32.totalorder %s2679_s16, %s2675_s15  ;;  %p3579_p4 = scmp.eq.s32.totalorder %s2743_s19, 0 }
   0xd   : > { %s2759_s24 = scalar_select %p26_p1, %s2683_s17, %s28_s22  }
   0xe   : > { %p2761_p5 = por %p36_p2, %p35_p0  ;;  %p2767_p6 = por %p3579_p4, %p41_p3 }
   0xf   : > { %p128_p7 = scmp.eq.s32.totalorder %s2743_s19, 1  ;;  %p134_p8 = scmp.eq.s32.totalorder %s2086_s20, 1 }
  0x10   : > { %s3604_s26 = scalar_select %p2767_p6, 1, 0 }
  0x11   : > { %p2087_p9 = scmp.ge.s32.totalorder %s2687_s18, 1  ;;  %p141_p10 = scmp.lt.s32.totalorder %s2687_s18, 3 }
  0x12   : > { %p2774_p11 = por %p128_p7, %p35_p0  ;;  %p2778_p12 = por %p134_p8, %p41_p3 }
  0x13   : > { %p2782_p13 = pnand %p2087_p9, %p141_p10  ;;  %s2689_s30 = smov [#allocation5]  }
  0x14   : > { %s3605_s27 = scalar_select %p2774_p11, 1, 0 }
  0x15   : > { %s3606_s28 = scalar_select %p2778_p12, 1, 0 }
  0x16   : > { %s3607_s29 = scalar_select %p2782_p13, 1, 0 }
  0x17   : > { %p2314_p2 = pneg %p2782_p13  ;;  %s154_s5 = sshll.u32 %s2689_s30, 4  ;;  %s155_s5 = int_to_ptr.vmem [resolvable:$true] %s154_s5 }
  0x18   : > { %p2331_p4 = scmp.lt.s32.totalorder %s2687_s18, 2  ;;  %p3608_p0 = scmp.eq.s32.totalorder %s2743_s19, 0 }
  0x19   : > { %s2690_s8 = smov [#allocation7]   ;;  %s2550_s10 = scalar_lea.vmem %s155_s5, 32 }
  0x1a   : > { %p2792_p7 = pnand %p2314_p2, %p3608_p0  ;;  %p2798_p3 = pnand %p2331_p4, %p2761_p5 }
  0x1b   : > { %s164_s9 = sshll.u32 %s2690_s8, 4  ;;  %p2551_p9 = scmp.ne.s32.totalorder %s155_s5, %s2550_s10  ;;  %s165_s9 = int_to_ptr.vmem [resolvable:$true] %s164_s9 }
  0x1c   : > { %p2541_p8 = pneg %p2792_p7  ;;  %p2558_p0 = scmp.lt.s32.totalorder %s155_s5, %s155_s5 }
  0x1d   : > { %p2559_p1 = scmp.lt.s32.totalorder %s2550_s10, %s2550_s10 }
  0x1e   : > { %p2553_p10 = pnand %p2551_p9, %p2541_p8 }
  0x1f   : > { %p2560_p12 = por %p2559_p1, %p2558_p0 }
  0x20   : > { %p2554_p2 = pneg %p2553_p10 }
  0x22   : > { %p2561_p11 = pnand %p2560_p12, %p2554_p2 }
  0x24   : > { %2564 = shalt.err (!%p2561_p11)
}
  0x25   : > { %s3611_s1 = sld [smem:[#allocation28_spill]]  ;;  %s181_s13 = sand.u32 1, %s2683_s17  }
  0x26   : > { %s2576_s14 = scalar_lea.vmem %s165_s9, 8192  ;;  %p2584_p10 = scmp.lt.s32.totalorder %s165_s9, %s165_s9 }
  0x27   : > { %p2577_p4 = scmp.ne.s32.totalorder %s165_s9, %s2576_s14  ;;  %p2585_p6 = scmp.lt.s32.totalorder %s2576_s14, %s2576_s14 }
  0x29   : > { %p2579_p5 = pnand %p2577_p4, %p2541_p8  ;;  %p2586_p1 = por %p2585_p6, %p2584_p10 }
  0x2b   : > { %2317 = dma.hbm_to_vmem [thread:$0]  (!%p2792_p7), %s3611_s1, 32, %s155_s5, [#allocation6]  }
  0x2c   : > { %p2580_p9 = pneg %p2579_p5 }
  0x2e   : > { %p2587_p12 = pnand %p2586_p1, %p2580_p9 }
  0x30   : > { %2590 = shalt.err (!%p2587_p12)
}
  0x31   : > { %s2691_s20 = smov 256   ;;  %s2692_s22 = smov 16  }
  0x32   : > { %2320 = dma.hbm_to_vmem [thread:$0]  (!%p2792_p7), %s3576_s2, 8192, %s165_s9, [#allocation6], %s2691_s20, %s2691_s20, %s2692_s22  }
  0x33   : > { %s2091_s30 = sshll.u32 %s181_s13, 9  ;;  %s2235_s5 = sshll.u32 %s2687_s18, 13 }
  0x34   : > { %s2828_s11 = scalar_lea.hbm %s3574_s0, %s2235_s5  ;;  %s185_s12 = scalar_lea.vmem [#allocation2], %s2091_s30 }
  0x35   : > { %s193_s14 = sshll.u32 %s185_s12, 4  ;;  %s2832_s6 = scalar_lea.sflag [#allocation3], %s181_s13  ;;  %s2830_s14 = int_to_ptr.vmem [resolvable:$true] %s193_s14 }
  0x36   : > { %s2591_s1 = scalar_lea.hbm %s2828_s11, 8192  ;;  %p2593_p11 = pneg %p2798_p3 }
  0x37   : > { %p2592_p6 = scmp.ne.s32.totalorder %s2828_s11, %s2591_s1  ;;  %s2596_s25 = scalar_lea.hbm %s3574_s0, 16384 }
  0x38   : > { %p2597_p2 = scmp.lt.s32.totalorder %s2828_s11, %s3574_s0  ;;  %p2598_p0 = scmp.lt.s32.totalorder %s2596_s25, %s2591_s1 }
  0x39   : > { %p2594_p7 = pnand %p2593_p11, %p2592_p6 }
  0x3a   : > { %p2599_p4 = por %p2598_p0, %p2597_p2 }
  0x3b   : > { %p2595_p8 = pneg %p2594_p7 }
  0x3d   : > { %p2600_p5 = pnand %p2599_p4, %p2595_p8 }
  0x3f   : > { %2603 = shalt.err (!%p2600_p5)
}
  0x40   : > { %s2604_s13 = scalar_lea.vmem %s2830_s14, 8192  ;;  %s2693_s30 = smov [#allocation2]  }
  0x41   : > { %p2605_p9 = scmp.ne.s32.totalorder %s2830_s14, %s2604_s13  ;;  %s2609_s10 = sshll.u32 %s2693_s30, 4  ;;  %s2610_s10 = int_to_ptr.vmem [resolvable:$false] %s2609_s10 }
  0x42   : > { %s2611_s12 = scalar_lea.vmem %s2610_s10, 16384  ;;  %p2612_p12 = scmp.lt.s32.totalorder %s2830_s14, %s2610_s10 }
  0x43   : > { %p2607_p10 = pnand %p2605_p9, %p2593_p11  ;;  %p2613_p6 = scmp.lt.s32.totalorder %s2611_s12, %s2604_s13 }
  0x45   : > { %p2608_p1 = pneg %p2607_p10  ;;  %p2614_p7 = por %p2613_p6, %p2612_p12 }
  0x47   : > { %p2615_p13 = pnand %p2614_p7, %p2608_p1 }
  0x49   : > { %2618 = shalt.err (!%p2615_p13)
}
  0x4a   : > { %2324 = dma.hbm_to_vmem [thread:$0]  (!%p2798_p3), %s2828_s11, 8192, %s2830_s14, %s2832_s6, %s2691_s20, %s2691_s20, %s2692_s22  }
  0x4b   : > { %p3612_p11 = scmp.ne.s32.totalorder %s3607_s29, 0 }
  0x4d   : > { %205 = sbr.rel (%p3612_p11) target bundleno = 598 (0x256), region = 36 }
  0x52   : > { %s2859_s1 = sand.u32 1, %s2679_s16   ;;  %p3613_p13 = scmp.ne.s32.totalorder %s3604_s26, 0 }
  0x53   : > { %s2096_s9 = sshll.u32 %s2859_s1, 9  ;;  %s208_s23 = scalar_lea.sflag [#allocation3], %s2859_s1 }
  0x54   : > { %s2865_s7 = scalar_lea.vmem [#allocation2], %s2096_s9 }
  0x55   : > { %2662 = dma.done.wait (%p3613_p13), %s208_s23, 8192  }
  0x56   : > { %2664 = vsyncadd (%p3613_p13), %s208_s23, 4294959104  ;;  %p3614_p3 = scmp.eq.s32.totalorder %s2743_s19, 0 }
  0x58   : > { %2666 = dma.done.wait (%p3614_p3), [#allocation6], 8224   ;;  %p3615_p8 = pmov %p3614_p3 }
  0x59   : > { %v2876_v0 = vld [vmem:[%s2865_s7] sm:$0xff]  ;;  %v2879_v1 = vld [vmem:[%s2865_s7 + $0x8] sm:$0xff]  ;;  %v2894_v7 = vld [vmem:[%s2865_s7 + $0x10] sm:$0xff]  ;;  %s3334_s20 = scalar_lea.vmem [#allocation8], %s2096_s9  ;;  %s2301_s22 = sshll.u32 %s2743_s19, 13 }
  0x5a   : > { %2668 = vsyncadd (%p3615_p8), [#allocation6], 4294959072  ;;  %v2882_v2 = vld [vmem:[%s2865_s7 + $0x20] sm:$0xff]  ;;  %v310_v3 = vmul.f32 %v2876_v0, %v2876_v0  ;;  %v311_v4 = vmul.f32 %v2879_v1, %v2879_v1  ;;  %v2889_v5 = vld [vmem:[%s2865_s7 + $0x28] sm:$0xff]  ;;  %v312_v10 = vmul.f32 %v2894_v7, %v2894_v7  ;;  %s1994_s11 = sshll.u32 %s3334_s20, 4  ;;  %s3527_s25 = scalar_lea.hbm %s3578_s4, %s2301_s22  ;;  %s3529_s11 = int_to_ptr.vmem [resolvable:$true] %s1994_s11 }
  0x5b   : > { %v314_v6 = vmul.f32 %v2882_v2, %v2882_v2  ;;  %v2897_v8 = vld [vmem:[%s2865_s7 + $0x18] sm:$0xff]  ;;  %v315_v9 = vmul.f32 %v2889_v5, %v2889_v5  ;;  %v2906_v12 = vld [vmem:[%s2865_s7 + $0x30] sm:$0xff]  ;;  %v2922_v19 = vld [vmem:[%s2865_s7 + $0x40] sm:$0xff]  ;;  %s1980_s19 = scalar_lea.sflag [#allocation4], %s2859_s1  ;;  %s2619_s5 = scalar_lea.vmem %s3529_s11, 8192 }
  0x5c   : > { %v313_v11 = vmul.f32 %v2897_v8, %v2897_v8  ;;  %v2909_v13 = vld [vmem:[%s2865_s7 + $0x38] sm:$0xff]  ;;  %v2912_v14 = vld [vmem:[%s2865_s7 + $0x50] sm:$0xff]  ;;  %v374_v15 = vadd.f32 %v311_v4, %v310_v3  ;;  %v316_v16 = vmul.f32 %v2906_v12, %v2906_v12  ;;  %v2925_v20 = vld [vmem:[%s2865_s7 + $0x48] sm:$0xff]  ;;  %v318_v23 = vmul.f32 %v2922_v19, %v2922_v19  ;;  %p2620_p2 = scmp.ne.s32.totalorder %s3529_s11, %s2619_s5  ;;  %p3650_p0 = scmp.ne.s32.totalorder %s3605_s27, 0 }
  0x5d   : > { %v317_v17 = vmul.f32 %v2909_v13, %v2909_v13  ;;  %v2919_v18 = vld [vmem:[%s2865_s7 + $0x58] sm:$0xff]  ;;  %v380_v21 = vadd.f32 %v315_v9, %v314_v6  ;;  %v319_v24 = vmul.f32 %v2925_v20, %v2925_v20  ;;  %v320_v26 = vmul.f32 %v2912_v14, %v2912_v14  ;;  %v2936_v28 = vld [vmem:[%s2865_s7 + $0x60] sm:$0xff]  ;;  %v2939_v29 = vld [vmem:[%s2865_s7 + $0x68] sm:$0xff]  ;;  %s2694_s8 = smov [#allocation8]  }
  0x5e   : > { %375 = vadd.xlane.f32.xlu0 %v374_v15  ;;  %v377_v22 = vadd.f32 %v313_v11, %v312_v10  ;;  %v321_v27 = vmul.f32 %v2919_v18, %v2919_v18  ;;  %v2942_v30 = vld [vmem:[%s2865_s7 + $0x70] sm:$0xff]  ;;  %v2945_v31 = vld [vmem:[%s2865_s7 + $0x78] sm:$0xff]  ;;  %v322_v33 = vmul.f32 %v2936_v28, %v2936_v28  ;;  %v323_v34 = vmul.f32 %v2939_v29, %v2939_v29  ;;  %v2956_v38 = vld [vmem:[%s2865_s7 + $0x80] sm:$0xff]  ;;  %p2621_p4 = pnand %p2620_p2, %p3650_p0  ;;  %s2623_s13 = sshll.u32 %s2694_s8, 4  ;;  %s2624_s13 = int_to_ptr.vmem [resolvable:$false] %s2623_s13 }
  0x5f   : > { %381 = vadd.xlane.f32.xlu1 %v380_v21  ;;  %v383_v25 = vadd.f32 %v317_v17, %v316_v16  ;;  %v386_v32 = vadd.f32 %v319_v24, %v318_v23  ;;  %v324_v36 = vmul.f32 %v2942_v30, %v2942_v30  ;;  %v325_v37 = vmul.f32 %v2945_v31, %v2945_v31  ;;  %v2959_v39 = vld [vmem:[%s2865_s7 + $0x88] sm:$0xff]  ;;  %v2962_v40 = vld [vmem:[%s2865_s7 + $0x90] sm:$0xff]  ;;  %v2965_v41 = vld [vmem:[%s2865_s7 + $0x98] sm:$0xff]  ;;  %s2625_s30 = scalar_lea.vmem %s2624_s13, 16384  ;;  %p2626_p9 = scmp.lt.s32.totalorder %s3529_s11, %s2624_s13 }
  0x60   : > { %v389_v35 = vadd.f32 %v321_v27, %v320_v26  ;;  %v392_v42 = vadd.f32 %v323_v34, %v322_v33  ;;  %v326_v43 = vmul.f32 %v2956_v38, %v2956_v38  ;;  %v327_v44 = vmul.f32 %v2959_v39, %v2959_v39  ;;  %v2976_v48 = vld [vmem:[%s2865_s7 + $0xa0] sm:$0xff]  ;;  %v2979_v49 = vld [vmem:[%s2865_s7 + $0xa8] sm:$0xff]  ;;  %v2982_v50 = vld [vmem:[%s2865_s7 + $0xb0] sm:$0xff]  ;;  %p2622_p5 = pneg %p2621_p4  ;;  %p2627_p10 = scmp.lt.s32.totalorder %s2625_s30, %s2619_s5 }
  0x61   : > { %v395_v45 = vadd.f32 %v325_v37, %v324_v36  ;;  %v328_v46 = vmul.f32 %v2962_v40, %v2962_v40  ;;  %v329_v47 = vmul.f32 %v2965_v41, %v2965_v41  ;;  %v2985_v51 = vld [vmem:[%s2865_s7 + $0xb8] sm:$0xff]  ;;  %v270_v52 = vld [vmem:[%s2865_s7 + $0xc0] sm:$0xff]  ;;  %v330_v54 = vmul.f32 %v2976_v48, %v2976_v48  ;;  %v272_v56 = vld [vmem:[%s2865_s7 + $0xd0] sm:$0xff] }
  0x62   : > { %378 = vadd.xlane.f32.xlu0 %v377_v22  ;;  %v398_v53 = vadd.f32 %v327_v44, %v326_v43  ;;  %v331_v55 = vmul.f32 %v2979_v49, %v2979_v49  ;;  %v2994_v57 = vld [vmem:[%s2865_s7 + $0xd8] sm:$0xff]  ;;  %v2997_v58 = vld [vmem:[%s2865_s7 + $0xc8] sm:$0xff]  ;;  %v332_v60 = vmul.f32 %v2982_v50, %v2982_v50  ;;  %v333_v61 = vmul.f32 %v2985_v51, %v2985_v51  ;;  %v2377_v3 = vld [vmem:[#allocation7 + $0xe0] ss:$16 sps:$4 sm:$0xff]   ;;  %p2628_p1 = por %p2627_p10, %p2626_p9 }
  0x63   : > { %384 = vadd.xlane.f32.xlu1 %v383_v25  ;;  %v401_v59 = vadd.f32 %v329_v47, %v328_v46  ;;  %v2373_v62 = vld [vmem:[#allocation7 + $0xe4] ss:$16 sps:$4 sm:$0xff]   ;;  %v2375_v63 = vld [vmem:[#allocation7 + $0xec] ss:$16 sps:$4 sm:$0xff]   ;;  %v2378_v4 = vld [vmem:[#allocation7 + $0xe8] ss:$16 sps:$4 sm:$0xff]   ;;  %v334_v10 = vmul.f32 %v270_v52, %v270_v52  ;;  %v335_v11 = vmul.f32 %v2997_v58, %v2997_v58  ;;  %v336_v17 = vmul.f32 %v272_v56, %v272_v56 }
  0x64   : > { %1145 = vmatprep.subr.bf16.mxu0 %v2373_v62  ;;  %v2379_v6 = vld [vmem:[#allocation7 + $0xc4] ss:$16 sps:$4 sm:$0xff]   ;;  %v404_v9 = vadd.f32 %v331_v55, %v330_v54  ;;  %1338 = vmatprep.subr.bf16.mxu1 %v2375_v63  ;;  %v2381_v15 = vld [vmem:[#allocation7 + $0xcc] ss:$16 sps:$4 sm:$0xff]   ;;  %v407_v16 = vadd.f32 %v333_v61, %v332_v60  ;;  %v337_v21 = vmul.f32 %v2994_v57, %v2994_v57  ;;  %v2383_v24 = vld [vmem:[#allocation7 + $0xc0] ss:$16 sps:$4 sm:$0xff]   ;;  %p2629_p12 = pnand %p2628_p1, %p2622_p5 }
  0x65   : > { %v3008_v22 = vld [vmem:[%s2865_s7 + $0xe0] sm:$0xff]  ;;  %v3011_v23 = vld [vmem:[%s2865_s7 + $0xe8] sm:$0xff]  ;;  %1146 = vmatpush1.bf16.msra.mxu0 %v2377_v3  ;;  %v3014_v25 = vld [vmem:[%s2865_s7 + $0xf0] sm:$0xff]  ;;  %1339 = vmatpush1.bf16.msra.mxu1 %v2378_v4 }
  0x66   : > { %387 = vadd.xlane.f32.xlu0 %v386_v32  ;;  %v3017_v26 = vld [vmem:[%s2865_s7 + $0xf8] sm:$0xff]  ;;  %1147 = vmatprep.subr.bf16.mxu0 %v2379_v6  ;;  %v278_v32 = vld [vmem:[%s2865_s7 + $0x100] sm:$0xff]  ;;  %v3021_v33 = vld [vmem:[%s2865_s7 + $0x108] sm:$0xff]  ;;  %v338_v36 = vmul.f32 %v3008_v22, %v3008_v22  ;;  %v339_v37 = vmul.f32 %v3011_v23, %v3011_v23  ;;  %v340_v46 = vmul.f32 %v3014_v25, %v3014_v25 }
  0x67   : > { %390 = vadd.xlane.f32.xlu1 %v389_v35  ;;  %v2384_v27 = vld [vmem:[#allocation7 + $0xc8] ss:$16 sps:$4 sm:$0xff]   ;;  %1340 = vmatprep.subr.bf16.mxu1 %v2381_v15  ;;  %v2385_v34 = vld [vmem:[#allocation7 + $0xa4] ss:$16 sps:$4 sm:$0xff]   ;;  %v410_v35 = vadd.f32 %v335_v11, %v334_v10  ;;  %v2387_v44 = vld [vmem:[#allocation7 + $0xac] ss:$16 sps:$4 sm:$0xff]   ;;  %v341_v47 = vmul.f32 %v3017_v26, %v3017_v26  ;;  %v343_v60 = vmul.f32 %v3021_v33, %v3021_v33 }
  0x68   : > { %v3031_v43 = vld [vmem:[%s2865_s7 + $0x118] sm:$0xff]  ;;  %v2389_v52 = vld [vmem:[#allocation7 + $0xa0] ss:$16 sps:$4 sm:$0xff]   ;;  %v416_v56 = vadd.f32 %v339_v37, %v338_v36  ;;  %v3049_v3 = vld [vmem:[%s2865_s7 + $0x128] sm:$0xff] }
  0x69   : > { %1148 = vmatpush1.bf16.msra.mxu0 %v2383_v24  ;;  %1341 = vmatpush1.bf16.msra.mxu1 %v2384_v27  ;;  %v2391_v54 = vld [vmem:[#allocation7 + $0x84] ss:$16 sps:$4 sm:$0xff]   ;;  %v2393_v55 = vld [vmem:[#allocation7 + $0x8c] ss:$16 sps:$4 sm:$0xff]   ;;  %v419_v4 = vadd.f32 %v341_v47, %v340_v46  ;;  %v2395_v10 = vld [vmem:[#allocation7 + $0x80] ss:$16 sps:$4 sm:$0xff]   ;;  %v347_v27 = vmul.f32 %v3049_v3, %v3049_v3 }
  0x6a   : > { %393 = vadd.xlane.f32.xlu0 %v392_v42  ;;  %v3028_v42 = vld [vmem:[%s2865_s7 + $0x110] sm:$0xff]  ;;  %1149 = vmatprep.subr.bf16.mxu0 %v2385_v34  ;;  %v3043_v62 = vld [vmem:[%s2865_s7 + $0x138] sm:$0xff]  ;;  %v3046_v63 = vld [vmem:[%s2865_s7 + $0x120] sm:$0xff] }
  0x6b   : > { %396 = vadd.xlane.f32.xlu1 %v395_v45  ;;  %v413_v45 = vadd.f32 %v337_v21, %v336_v17  ;;  %1342 = vmatprep.subr.bf16.mxu1 %v2387_v44  ;;  %v3040_v61 = vld [vmem:[%s2865_s7 + $0x130] sm:$0xff]  ;;  %v344_v6 = vmul.f32 %v3028_v42, %v3028_v42  ;;  %v2396_v11 = vld [vmem:[#allocation7 + $0x88] ss:$16 sps:$4 sm:$0xff]   ;;  %v346_v24 = vmul.f32 %v3046_v63, %v3046_v63 }
  0x6c   : > { %v2397_v15 = vld [vmem:[#allocation7 + $0x64] ss:$16 sps:$4 sm:$0xff]   ;;  %v2399_v17 = vld [vmem:[#allocation7 + $0x6c] ss:$16 sps:$4 sm:$0xff]   ;;  %v348_v36 = vmul.f32 %v3040_v61, %v3040_v61  ;;  %v349_v37 = vmul.f32 %v3043_v62, %v3043_v62  ;;  %v2401_v44 = vld [vmem:[#allocation7 + $0x60] ss:$16 sps:$4 sm:$0xff]  }
  0x6d   : > { %1150 = vmatpush1.bf16.msra.mxu0 %v2389_v52  ;;  %v3064_v34 = vld [vmem:[%s2865_s7 + $0x148] sm:$0xff]  ;;  %v290_v52 = vld [vmem:[%s2865_s7 + $0x160] sm:$0xff] }
  0x6e   : > { %399 = vadd.xlane.f32.xlu0 %v398_v53  ;;  %v2390_v53 = vld [vmem:[#allocation7 + $0xa8] ss:$16 sps:$4 sm:$0xff]   ;;  %1151 = vmatprep.subr.bf16.mxu0 %v2391_v54  ;;  %v2403_v47 = vld [vmem:[#allocation7 + $0x44] ss:$16 sps:$4 sm:$0xff]   ;;  %v428_v54 = vadd.f32 %v347_v27, %v346_v24  ;;  %v354_v27 = vmul.f32 %v290_v52, %v290_v52  ;;  %v2413_v52 = vld [vmem:[#allocation7 + $0x20] ss:$16 sps:$4 sm:$0xff]  }
  0x6f   : > { %402 = vadd.xlane.f32.xlu1 %v401_v59  ;;  %v342_v59 = vmul.f32 %v278_v32, %v278_v32  ;;  %1343 = vmatpush1.bf16.msra.mxu1 %v2390_v53  ;;  %v3061_v32 = vld [vmem:[%s2865_s7 + $0x150] sm:$0xff]  ;;  %v2402_v46 = vld [vmem:[#allocation7 + $0x68] ss:$16 sps:$4 sm:$0xff]  }
  0x70   : > { %1344 = vmatprep.subr.bf16.mxu1 %v2393_v55  ;;  %v2405_v53 = vld [vmem:[#allocation7 + $0x4c] ss:$16 sps:$4 sm:$0xff]  }
  0x71   : > { %v422_v21 = vadd.f32 %v343_v60, %v342_v59  ;;  %1152 = vmatpush1.bf16.msra.mxu0 %v2395_v10  ;;  %v3077_v59 = vld [vmem:[%s2865_s7 + $0x170] sm:$0xff]  ;;  %v3080_v60 = vld [vmem:[%s2865_s7 + $0x168] sm:$0xff] }
  0x72   : > { %405 = vadd.xlane.f32.xlu0 %v404_v9  ;;  %v345_v9 = vmul.f32 %v3031_v43, %v3031_v43  ;;  %1153 = vmatprep.subr.bf16.mxu0 %v2397_v15  ;;  %3616 = vst [vmem:[#allocation12_spill] sm:$0xff] %v3077_v59  ;;  %3617 = vst [vmem:[#allocation13_spill] sm:$0xff] %v3080_v60  ;;  %v2407_v10 = vld [vmem:[#allocation7 + $0x40] ss:$16 sps:$4 sm:$0xff]   ;;  %v2408_v15 = vld [vmem:[#allocation7 + $0x48] ss:$16 sps:$4 sm:$0xff]  }
  0x73   : > { %408 = vadd.xlane.f32.xlu1 %v407_v16  ;;  %v286_v16 = vld [vmem:[%s2865_s7 + $0x140] sm:$0xff]  ;;  %1345 = vmatpush1.bf16.msra.mxu1 %v2396_v11  ;;  %v3087_v11 = vld [vmem:[%s2865_s7 + $0x178] sm:$0xff] }
  0x74   : > { %1346 = vmatprep.subr.bf16.mxu1 %v2399_v17  ;;  %v350_v55 = vmul.f32 %v286_v16, %v286_v16  ;;  %3618 = vst [vmem:[#allocation14_spill] sm:$0xff] %v3087_v11  ;;  %v2409_v16 = vld [vmem:[#allocation7 + $0x24] ss:$16 sps:$4 sm:$0xff]  }
  0x75   : > { %1154 = vmatpush1.bf16.msra.mxu0 %v2401_v44  ;;  %v294_v17 = vld [vmem:[%s2865_s7 + $0x180] sm:$0xff]  ;;  %v3099_v44 = vld [vmem:[%s2865_s7 + $0x188] sm:$0xff] }
  0x76   : > { %411 = vadd.xlane.f32.xlu0 %v410_v35  ;;  %v425_v35 = vadd.f32 %v345_v9, %v344_v6  ;;  %v352_v6 = vmul.f32 %v3061_v32, %v3061_v32  ;;  %1155 = vmatprep.subr.bf16.mxu0 %v2403_v47  ;;  %3621 = vst [vmem:[#allocation17_spill] sm:$0xff] %v3099_v44 }
  0x77   : > { %414 = vadd.xlane.f32.xlu1 %v413_v45  ;;  %v3071_v45 = vld [vmem:[%s2865_s7 + $0x158] sm:$0xff]  ;;  %1347 = vmatpush1.bf16.msra.mxu1 %v2402_v46  ;;  %v356_v47 = vmul.f32 %v3077_v59, %v3077_v59  ;;  %v359_v59 = vmul.f32 %v3099_v44, %v3099_v44  ;;  %v3124_v44 = vld [vmem:[%s2865_s7 + $0x1c0] sm:$0xff] }
  0x78   : > { %v353_v9 = vmul.f32 %v3071_v45, %v3071_v45  ;;  %1348 = vmatprep.subr.bf16.mxu1 %v2405_v53  ;;  %v357_v53 = vmul.f32 %v3087_v11, %v3087_v11  ;;  %3626 = vst [vmem:[#allocation22_spill] sm:$0xff] %v3124_v44 }
  0x79   : > { %1156 = vmatpush1.bf16.msra.mxu0 %v2407_v10  ;;  %v3114_v10 = vld [vmem:[%s2865_s7 + $0x1a8] sm:$0xff] }
  0x7a   : > { %417 = vadd.xlane.f32.xlu0 %v416_v56  ;;  %v351_v56 = vmul.f32 %v3064_v34, %v3064_v34  ;;  %v437_v46 = vadd.f32 %v353_v9, %v352_v6  ;;  %1157 = vmatprep.subr.bf16.mxu0 %v2409_v16  ;;  %v358_v9 = vmul.f32 %v294_v17, %v294_v17  ;;  %v2419_v17 = vld [vmem:[#allocation7] ss:$16 sps:$4 sm:$0xff]  }
  0x7b   : > { %420 = vadd.xlane.f32.xlu1 %v419_v4  ;;  %v431_v4 = vadd.f32 %v349_v37, %v348_v36  ;;  %v3093_v36 = vld [vmem:[%s2865_s7 + $0x190] sm:$0xff]  ;;  %v3096_v37 = vld [vmem:[%s2865_s7 + $0x198] sm:$0xff]  ;;  %1349 = vmatpush1.bf16.msra.mxu1 %v2408_v15  ;;  %3624 = vst [vmem:[#allocation20_spill] sm:$0xff] %v3114_v10  ;;  %v443_v15 = vadd.f32 %v357_v53, %v356_v47 }
  0x7c   : > { %v434_v24 = vadd.f32 %v351_v56, %v350_v55  ;;  %3619 = vst [vmem:[#allocation15_spill] sm:$0xff] %v3093_v36  ;;  %3620 = vst [vmem:[#allocation16_spill] sm:$0xff] %v3096_v37  ;;  %v2415_v55 = vld [vmem:[#allocation7 + $0x4] ss:$16 sps:$4 sm:$0xff]   ;;  %v360_v16 = vmul.f32 %v3093_v36, %v3093_v36  ;;  %v446_v47 = vadd.f32 %v359_v59, %v358_v9  ;;  %v2426_v9 = vld [vmem:[#allocation7 + $0x1e8] ss:$16 sps:$4 sm:$0xff]  }
  0x7d   : > { %v3106_v56 = vld [vmem:[%s2865_s7 + $0x1a0] sm:$0xff]  ;;  %1158 = vmatpush1.bf16.msra.mxu0 %v2413_v52  ;;  %v363_v52 = vmul.f32 %v3114_v10, %v3114_v10  ;;  %v3131_v36 = vld [vmem:[%s2865_s7 + $0x1d0] sm:$0xff] }
  0x7e   : > { %423 = vadd.xlane.f32.xlu0 %v422_v21  ;;  %v2411_v21 = vld [vmem:[#allocation7 + $0x2c] ss:$16 sps:$4 sm:$0xff]   ;;  %3622 = vst [vmem:[#allocation18_spill] sm:$0xff] %v3106_v56  ;;  %1159 = vmatprep.subr.bf16.mxu0 %v2415_v55  ;;  %v362_v53 = vmul.f32 %v3106_v56, %v3106_v56  ;;  %v2427_v56 = vld [vmem:[#allocation7 + $0x1c4] ss:$16 sps:$4 sm:$0xff]  }
  0x7f   : > { %426 = vadd.xlane.f32.xlu1 %v425_v35  ;;  %v355_v35 = vmul.f32 %v3080_v60, %v3080_v60  ;;  %1350 = vmatprep.subr.bf16.mxu1 %v2411_v21  ;;  %v3111_v60 = vld [vmem:[%s2865_s7 + $0x1b0] sm:$0xff]  ;;  %v361_v21 = vmul.f32 %v3096_v37, %v3096_v37  ;;  %v3134_v37 = vld [vmem:[%s2865_s7 + $0x1d8] sm:$0xff]  ;;  %v3144_v10 = vld [vmem:[%s2865_s7 + $0x1e0] sm:$0xff] }
  0x80   : > { %3623 = vst [vmem:[#allocation19_spill] sm:$0xff] %v3111_v60  ;;  %3628 = vst [vmem:[#allocation24_spill] sm:$0xff] %v3144_v10 }
  0x81   : > { %v440_v6 = vadd.f32 %v355_v35, %v354_v27  ;;  %v2420_v27 = vld [vmem:[#allocation7 + $0x8] ss:$16 sps:$4 sm:$0xff]   ;;  %v2421_v35 = vld [vmem:[#allocation7 + $0x1e4] ss:$16 sps:$4 sm:$0xff]   ;;  %v449_v55 = vadd.f32 %v361_v21, %v360_v16  ;;  %1160 = vmatpush1.bf16.msra.mxu0 %v2419_v17  ;;  %v452_v16 = vadd.f32 %v363_v52, %v362_v53  ;;  %v366_v21 = vmul.f32 %v3124_v44, %v3124_v44 }
  0x82   : > { %429 = vadd.xlane.f32.xlu0 %v428_v54  ;;  %v2414_v54 = vld [vmem:[#allocation7 + $0x28] ss:$16 sps:$4 sm:$0xff]   ;;  %1161 = vmatprep.subr.bf16.mxu0 %v2421_v35  ;;  %v368_v35 = vmul.f32 %v3131_v36, %v3131_v36  ;;  %v2433_v44 = vld [vmem:[#allocation7 + $0x1a4] ss:$16 sps:$4 sm:$0xff]  }
  0x83   : > { %432 = vadd.xlane.f32.xlu1 %v431_v4  ;;  %v2417_v4 = vld [vmem:[#allocation7 + $0xc] ss:$16 sps:$4 sm:$0xff]   ;;  %1351 = vmatpush1.bf16.msra.mxu1 %v2414_v54  ;;  %v2432_v52 = vld [vmem:[#allocation7 + $0x1c8] ss:$16 sps:$4 sm:$0xff]  }
  0x84   : > { %1352 = vmatprep.subr.bf16.mxu1 %v2417_v4  ;;  %v3137_v54 = vld [vmem:[%s2865_s7 + $0x1c8] sm:$0xff]  ;;  %v364_v4 = vmul.f32 %v3111_v60, %v3111_v60  ;;  %v3161_v53 = vld [vmem:[%s2865_s7 + $0x1f8] sm:$0xff] }
  0x85   : > { %3627 = vst [vmem:[#allocation23_spill] sm:$0xff] %v3137_v54  ;;  %v367_v60 = vmul.f32 %v3137_v54, %v3137_v54  ;;  %v3154_v17 = vld [vmem:[%s2865_s7 + $0x1e8] sm:$0xff]  ;;  %3630 = vst [vmem:[#allocation26_spill] sm:$0xff] %v3161_v53 }
  0x86   : > { %435 = vadd.xlane.f32.xlu0 %v434_v24  ;;  %v3121_v24 = vld [vmem:[%s2865_s7 + $0x1b8] sm:$0xff] }
  0x87   : > { %438 = vadd.xlane.f32.xlu1 %v437_v46  ;;  %3625 = vst [vmem:[#allocation21_spill] sm:$0xff] %v3121_v24  ;;  %v2423_v46 = vld [vmem:[#allocation7 + $0x1ec] ss:$16 sps:$4 sm:$0xff]   ;;  %v365_v59 = vmul.f32 %v3121_v24, %v3121_v24  ;;  %1353 = vmatpush1.bf16.msra.mxu1 %v2420_v27  ;;  %v458_v11 = vadd.f32 %v367_v60, %v366_v21  ;;  %v2439_v60 = vld [vmem:[#allocation7 + $0x184] ss:$16 sps:$4 sm:$0xff]  }
  0x88   : > { %1354 = vmatprep.subr.bf16.mxu1 %v2423_v46  ;;  %v3151_v24 = vld [vmem:[%s2865_s7 + $0x1f0] sm:$0xff]  ;;  %v369_v46 = vmul.f32 %v3134_v37, %v3134_v37 }
  0x89   : > { %3629 = vst [vmem:[#allocation25_spill] sm:$0xff] %v3151_v24  ;;  %v455_v27 = vadd.f32 %v365_v59, %v364_v4  ;;  %v2435_v54 = vld [vmem:[#allocation7 + $0x1ac] ss:$16 sps:$4 sm:$0xff]   ;;  %v371_v4 = vmul.f32 %v3154_v17, %v3154_v17 }
  0x8a   : > { %441 = vadd.xlane.f32.xlu0 %v440_v6  ;;  %v2425_v6 = vld [vmem:[#allocation7 + $0x1e0] ss:$16 sps:$4 sm:$0xff]   ;;  %v461_v59 = vadd.f32 %v369_v46, %v368_v35  ;;  %v2444_v35 = vld [vmem:[#allocation7 + $0x188] ss:$16 sps:$4 sm:$0xff]   ;;  %v2445_v46 = vld [vmem:[#allocation7 + $0x164] ss:$16 sps:$4 sm:$0xff]  }
  0x8b   : > { %444 = vadd.xlane.f32.xlu1 %v443_v15  ;;  %v2429_v15 = vld [vmem:[#allocation7 + $0x1cc] ss:$16 sps:$4 sm:$0xff]   ;;  %1162 = vmatpush2.bf16.msra.mxu0 %v2425_v6  ;;  %v372_v6 = vmul.f32 %v3151_v24, %v3151_v24 }
  0x8c   : > { %1355 = vmatpush2.bf16.msra.mxu1 %v2426_v9  ;;  %1163 = vmatprep.subr.bf16.mxu0 %v2427_v56  ;;  %v373_v56 = vmul.f32 %v3161_v53, %v3161_v53  ;;  %v2437_v9 = vld [vmem:[#allocation7 + $0x1a0] ss:$16 sps:$4 sm:$0xff]   ;;  %v2447_v24 = vld [vmem:[#allocation7 + $0x16c] ss:$16 sps:$4 sm:$0xff]  }
  0x8d   : > { %1356 = vmatprep.subr.bf16.mxu1 %v2429_v15  ;;  %v2438_v15 = vld [vmem:[#allocation7 + $0x1a8] ss:$16 sps:$4 sm:$0xff]  }
  0x8e   : > { %447 = vadd.xlane.f32.xlu0 %v446_v47  ;;  %v2431_v47 = vld [vmem:[#allocation7 + $0x1c0] ss:$16 sps:$4 sm:$0xff]  }
  0x8f   : > { %450 = vadd.xlane.f32.xlu1 %v449_v55  ;;  %v370_v55 = vmul.f32 %v3144_v10, %v3144_v10  ;;  %1164 = vmatpush2.bf16.msra.mxu0 %v2431_v47  ;;  %v467_v10 = vadd.f32 %v373_v56, %v372_v6  ;;  %v2449_v47 = vld [vmem:[#allocation7 + $0x160] ss:$16 sps:$4 sm:$0xff]   ;;  %v2463_v56 = vld [vmem:[#allocation7 + $0x104] ss:$16 sps:$4 sm:$0xff]  }
  0x90   : > { %1357 = vmatpush2.bf16.msra.mxu1 %v2432_v52  ;;  %1165 = vmatprep.subr.bf16.mxu0 %v2433_v44  ;;  %v2450_v44 = vld [vmem:[#allocation7 + $0x168] ss:$16 sps:$4 sm:$0xff]   ;;  %v2455_v52 = vld [vmem:[#allocation7 + $0x140] ss:$16 sps:$4 sm:$0xff]  }
  0x91   : > { %1358 = vmatprep.subr.bf16.mxu1 %v2435_v54  ;;  %v464_v21 = vadd.f32 %v371_v4, %v370_v55  ;;  %v2451_v54 = vld [vmem:[#allocation7 + $0x144] ss:$16 sps:$4 sm:$0xff]   ;;  %v2456_v55 = vld [vmem:[#allocation7 + $0x148] ss:$16 sps:$4 sm:$0xff]   ;;  %v2461_v6 = vld [vmem:[#allocation7 + $0x120] ss:$16 sps:$4 sm:$0xff]  }
  0x92   : > { %453 = vadd.xlane.f32.xlu0 %v452_v16  ;;  %v2441_v16 = vld [vmem:[#allocation7 + $0x18c] ss:$16 sps:$4 sm:$0xff]   ;;  %v2457_v4 = vld [vmem:[#allocation7 + $0x124] ss:$16 sps:$4 sm:$0xff]  }
  0x93   : > { %456 = vadd.xlane.f32.xlu1 %v455_v27  ;;  %1166 = vmatpush2.bf16.msra.mxu0 %v2437_v9  ;;  %v2443_v27 = vld [vmem:[#allocation7 + $0x180] ss:$16 sps:$4 sm:$0xff]   ;;  %v2465_v9 = vld [vmem:[#allocation7 + $0x10c] ss:$16 sps:$4 sm:$0xff]  }
  0x94   : > { %1359 = vmatpush2.bf16.msra.mxu1 %v2438_v15  ;;  %1167 = vmatprep.subr.bf16.mxu0 %v2439_v60  ;;  %v2467_v15 = vld [vmem:[#allocation7 + $0x100] ss:$16 sps:$4 sm:$0xff]  }
  0x95   : > { %1360 = vmatprep.subr.bf16.mxu1 %v2441_v16 }
  0x96   : > { %459 = vadd.xlane.f32.xlu0 %v458_v11  ;;  %v2453_v11 = vld [vmem:[#allocation7 + $0x14c] ss:$16 sps:$4 sm:$0xff]  }
  0x97   : > { %462 = vadd.xlane.f32.xlu1 %v461_v59  ;;  %1168 = vmatpush2.bf16.msra.mxu0 %v2443_v27  ;;  %v2459_v59 = vld [vmem:[#allocation7 + $0x12c] ss:$16 sps:$4 sm:$0xff]  }
  0x98   : > { %1361 = vmatpush2.bf16.msra.mxu1 %v2444_v35  ;;  %1169 = vmatprep.subr.bf16.mxu0 %v2445_v46 }
  0x99   : > { %1362 = vmatprep.subr.bf16.mxu1 %v2447_v24  ;;  %v2468_v24 = vld [vmem:[#allocation7 + $0x108] ss:$16 sps:$4 sm:$0xff]  }
  0x9a   : > { %465 = vadd.xlane.f32.xlu0 %v464_v21 }
  0x9b   : > { %468 = vadd.xlane.f32.xlu1 %v467_v10  ;;  %1170 = vmatpush2.bf16.msra.mxu0 %v2449_v47  ;;  %v2462_v10 = vld [vmem:[#allocation7 + $0x128] ss:$16 sps:$4 sm:$0xff]  }
  0x9c   : > { %1363 = vmatpush2.bf16.msra.mxu1 %v2450_v44  ;;  %1171 = vmatprep.subr.bf16.mxu0 %v2451_v54 }
  0x9d   : > { %1364 = vmatprep.subr.bf16.mxu1 %v2453_v11 }
  0x9f   : > { %1172 = vmatpush2.bf16.msra.mxu0 %v2455_v52 }
  0xa0   : > { %1365 = vmatpush2.bf16.msra.mxu1 %v2456_v55  ;;  %1173 = vmatprep.subr.bf16.mxu0 %v2457_v4  ;;  %v633_v55 = vlaneseq }
  0xa1   : > { %1366 = vmatprep.subr.bf16.mxu1 %v2459_v59 }
  0xa3   : > { %1174 = vmatpush2.bf16.msra.mxu0 %v2461_v6 }
  0xa4   : > { %1367 = vmatpush2.bf16.msra.mxu1 %v2462_v10  ;;  %1175 = vmatprep.subr.bf16.mxu0 %v2463_v56 }
  0xa5   : > { %1368 = vmatprep.subr.bf16.mxu1 %v2465_v9 }
  0xa7   : > { %1176 = vmatpush2.bf16.msra.mxu0 %v2467_v15  ;;  %v3171_v15 = vshrl.u32 %v633_v55, 7 }
  0xa8   : > { %1369 = vmatpush2.bf16.msra.mxu1 %v2468_v24 }
  0xa9   : > { %3631 = vst [vmem:[#allocation27_spill] sm:$0xff] %v3171_v15 }
  0xe7   : > { %v376_v60 = vpop.xlane.xlu0 %375 }
  0xe8   : > { %v471_v16 = vmul.f32 0.00390625, %v376_v60  ;;  %v382_v21 = vpop.xlane.xlu1 %381 }
  0xe9   : > { %v473_v27 = vmul.f32 0.00390625, %v382_v21 }
  0xea   : > { %v503_v35 = vadd.f32 1e-06, %v471_v16 }
  0xeb   : > { %v505_v46 = vadd.f32 1e-06, %v473_v27  ;;  %v379_v47 = vpop.xlane.xlu0 %378 }
  0xec   : > { %2469 = vrsqrt.f32 %v503_v35  ;;  %v472_v44 = vmul.f32 0.00390625, %v379_v47  ;;  %v385_v54 = vpop.xlane.xlu1 %384 }
  0xed   : > { %2471 = vrsqrt.f32 %v505_v46  ;;  %v474_v11 = vmul.f32 0.00390625, %v385_v54  ;;  %v3597_v46 = vsub.s32 0, %v3171_v15  ;;  %v3598_v54 = vsub.s32 1, %v3171_v15 }
  0xee   : > { %v504_v52 = vadd.f32 1e-06, %v472_v44  ;;  %v631_v44 = vld [vmem:[#allocation5] sm:$0x3] }
  0xef   : > { %v506_v4 = vadd.f32 1e-06, %v474_v11  ;;  %v388_v59 = vpop.xlane.xlu0 %387 }
  0xf0   : > { %2473 = vrsqrt.f32 %v504_v52  ;;  %v391_v6 = vpop.xlane.xlu1 %390  ;;  %v475_v10 = vmul.f32 0.00390625, %v388_v59 }
  0xf1   : > { %2475 = vrsqrt.f32 %v506_v4  ;;  %v476_v56 = vmul.f32 0.00390625, %v391_v6 }
  0xf2   : > { %v507_v9 = vadd.f32 1e-06, %v475_v10  ;;  %v3177_v10 = vrot.slane %v631_v44, %v3597_v46 }
  0xf3   : > { %v508_v24 = vadd.f32 1e-06, %v476_v56  ;;  %v394_v60 = vpop.xlane.xlu0 %393 }
  0xf4   : > { %2477 = vrsqrt.f32 %v507_v9  ;;  %v397_v16 = vpop.xlane.xlu1 %396  ;;  %v477_v21 = vmul.f32 0.00390625, %v394_v60  ;;  %v3182_v9 = vrot.slane %v631_v44, %v3598_v54 }
  0xf5   : > { %2479 = vrsqrt.f32 %v508_v24  ;;  %v478_v27 = vmul.f32 0.00390625, %v397_v16 }
  0xf6   : > { %v509_v35 = vadd.f32 1e-06, %v477_v21 }
  0xf7   : > { %v510_v47 = vadd.f32 1e-06, %v478_v27  ;;  %v400_v11 = vpop.xlane.xlu0 %399 }
  0xf8   : > { %v403_v52 = vpop.xlane.xlu1 %402  ;;  %v479_v4 = vmul.f32 0.00390625, %v400_v11  ;;  %2481 = vrsqrt.f32 %v509_v35 }
  0xf9   : > { %v2470_v59 = vpop.eup %2469  ;;  %v480_v55 = vmul.f32 0.00390625, %v403_v52  ;;  %2483 = vrsqrt.f32 %v510_v47 }
  0xfa   : > { %v2472_v6 = vpop.eup %2471  ;;  %v568_v56 = vmul.f32 %v2470_v59, %v2879_v1  ;;  %v567_v24 = vmul.f32 %v2470_v59, %v2876_v0  ;;  %v511_v16 = vadd.f32 1e-06, %v479_v4 }
  0xfb   : > { %v572_v60 = vmul.f32 %v2472_v6, %v2889_v5  ;;  %v512_v27 = vadd.f32 1e-06, %v480_v55  ;;  %v406_v35 = vpop.xlane.xlu0 %405 }
  0xfc   : > { %v644_v46 = vmul.f32 %v3182_v9, %v568_v56  ;;  %v643_v1 = vmul.f32 %v3177_v10, %v567_v24  ;;  %v409_v0 = vpop.xlane.xlu1 %408  ;;  %2485 = vrsqrt.f32 %v511_v16  ;;  %v481_v59 = vmul.f32 0.00390625, %v406_v35 }
  0xfd   : > { %v2474_v21 = vpop.eup %2473  ;;  %v648_v54 = vmul.f32 %v3182_v9, %v572_v60  ;;  %2487 = vrsqrt.f32 %v512_v27  ;;  %v482_v15 = vmul.f32 0.00390625, %v409_v0  ;;  %v571_v60 = vmul.f32 %v2472_v6, %v2882_v2 }
  0xfe   : > { %v2476_v11 = vpop.eup %2475  ;;  %v570_v47 = vmul.f32 %v2474_v21, %v2897_v8  ;;  %v569_v52 = vmul.f32 %v2474_v21, %v2894_v7  ;;  %v513_v16 = vadd.f32 1e-06, %v481_v59 }
  0xff   : > { %v574_v44 = vmul.f32 %v2476_v11, %v2909_v13  ;;  %v573_v53 = vmul.f32 %v2476_v11, %v2906_v12  ;;  %v647_v12 = vmul.f32 %v3177_v10, %v571_v60 }
 0x100   : > { %v646_v5 = vmul.f32 %v3182_v9, %v570_v47  ;;  %v645_v4 = vmul.f32 %v3177_v10, %v569_v52  ;;  %v412_v52 = vpop.xlane.xlu0 %411  ;;  %2489 = vrsqrt.f32 %v513_v16 }
 0x101   : > { %v2478_v55 = vpop.eup %2477  ;;  %v650_v8 = vmul.f32 %v3182_v9, %v574_v44  ;;  %v483_v44 = vmul.f32 0.00390625, %v412_v52 }
 0x102   : > { %v2480_v7 = vpop.eup %2479  ;;  %v708_v21 = vpack.c.bf16 %v646_v5, %v644_v46  ;;  %v707_v56 = vpack.c.bf16 %v645_v4, %v643_v1  ;;  %v576_v24 = vmul.f32 %v2478_v55, %v2925_v20  ;;  %v514_v46 = vadd.f32 1e-06, %v482_v15 }
 0x103   : > { %v710_v13 = vpack.c.bf16 %v650_v8, %v648_v54  ;;  %v578_v47 = vmul.f32 %v2480_v7, %v2919_v18  ;;  %v415_v54 = vpop.xlane.xlu1 %414  ;;  %v649_v18 = vmul.f32 %v3177_v10, %v573_v53  ;;  %v575_v6 = vmul.f32 %v2478_v55, %v2922_v19 }
 0x104   : > { %1177 = vmatprep.mubr.bf16.mxu0 %v708_v21  ;;  %1370 = vmatprep.mubr.bf16.mxu1 %v708_v21  ;;  %v652_v27 = vmul.f32 %v3182_v9, %v576_v24  ;;  %v577_v11 = vmul.f32 %v2480_v7, %v2912_v14  ;;  %v484_v1 = vmul.f32 0.00390625, %v415_v54  ;;  %2491 = vrsqrt.f32 %v514_v46  ;;  %v418_v55 = vpop.xlane.xlu0 %417 }
 0x105   : > { %1178 = vmatmul.mubr.bf16.vlgmr.msra.gmra.mxu0 %v707_v56  ;;  %1371 = vmatmul.mubr.bf16.vlgmr.msra.gmra.mxu1 %v707_v56  ;;  %v2482_v35 = vpop.eup %2481  ;;  %v654_v20 = vmul.f32 %v3182_v9, %v578_v47  ;;  %v709_v4 = vpack.c.bf16 %v649_v18, %v647_v12  ;;  %v651_v8 = vmul.f32 %v3177_v10, %v575_v6  ;;  %v515_v7 = vadd.f32 1e-06, %v483_v44 }
 0x106   : > { %1187 = vmatprep.mubr.bf16.mxu0 %v710_v13  ;;  %1380 = vmatprep.mubr.bf16.mxu1 %v710_v13  ;;  %v2484_v2 = vpop.eup %2483  ;;  %v580_v0 = vmul.f32 %v2482_v35, %v2939_v29  ;;  %v653_v53 = vmul.f32 %v3177_v10, %v577_v11  ;;  %v516_v21 = vadd.f32 1e-06, %v484_v1  ;;  %v485_v24 = vmul.f32 0.00390625, %v418_v55 }
 0x107   : > { %v712_v15 = vpack.c.bf16 %v654_v20, %v652_v27  ;;  %v582_v5 = vmul.f32 %v2484_v2, %v2945_v31  ;;  %v421_v19 = vpop.xlane.xlu1 %420  ;;  %v579_v60 = vmul.f32 %v2482_v35, %v2936_v28  ;;  %v581_v47 = vmul.f32 %v2484_v2, %v2942_v30 }
 0x108   : > { %v656_v56 = vmul.f32 %v3182_v9, %v580_v0  ;;  %v486_v31 = vmul.f32 0.00390625, %v421_v19  ;;  %v711_v13 = vpack.c.bf16 %v653_v53, %v651_v8  ;;  %2493 = vrsqrt.f32 %v516_v21  ;;  %v424_v6 = vpop.xlane.xlu0 %423 }
 0x109   : > { %v2486_v59 = vpop.eup %2485  ;;  %v658_v29 = vmul.f32 %v3182_v9, %v582_v5  ;;  %2495 = vrsqrt.f32 %v515_v7  ;;  %v655_v54 = vmul.f32 %v3177_v10, %v579_v60  ;;  %v657_v52 = vmul.f32 %v3177_v10, %v581_v47 }
 0x10a   : > { %v2488_v14 = vpop.eup %2487  ;;  %v584_v46 = vmul.f32 %v2486_v59, %v2959_v39  ;;  %v518_v12 = vadd.f32 1e-06, %v486_v31  ;;  %v517_v28 = vadd.f32 1e-06, %v485_v24  ;;  %v583_v1 = vmul.f32 %v2486_v59, %v2956_v38 }
 0x10b   : > { %v714_v16 = vpack.c.bf16 %v658_v29, %v656_v56  ;;  %v586_v27 = vmul.f32 %v2488_v14, %v2965_v41  ;;  %v427_v18 = vpop.xlane.xlu1 %426  ;;  %v487_v41 = vmul.f32 0.00390625, %v424_v6  ;;  %v713_v11 = vpack.c.bf16 %v657_v52, %v655_v54 }
 0x10c   : > { %v660_v30 = vmul.f32 %v3182_v9, %v584_v46  ;;  %v488_v2 = vmul.f32 0.00390625, %v427_v18  ;;  %2497 = vrsqrt.f32 %v518_v12  ;;  %v585_v44 = vmul.f32 %v2488_v14, %v2962_v40  ;;  %v430_v55 = vpop.xlane.xlu0 %429  ;;  %v2533_v18 = vld [vmem:[%s2865_s7 + $0xc0] sm:$0xff] }
 0x10d   : > { %1188 = vmatmul.mubr.bf16.gmra.mxu0 %v709_v4  ;;  %1381 = vmatmul.mubr.bf16.gmra.mxu1 %v709_v4  ;;  %v2490_v20 = vpop.eup %2489  ;;  %v662_v35 = vmul.f32 %v3182_v9, %v586_v27  ;;  %2499 = vrsqrt.f32 %v517_v28  ;;  %v659_v8 = vmul.f32 %v3177_v10, %v583_v1  ;;  %v519_v38 = vadd.f32 1e-06, %v487_v41  ;;  %v2534_v28 = vld [vmem:[%s2865_s7 + $0xd0] sm:$0xff] }
 0x10e   : > { %1197 = vmatprep.mubr.bf16.mxu0 %v712_v15  ;;  %1390 = vmatprep.mubr.bf16.mxu1 %v712_v15  ;;  %v588_v0 = vmul.f32 %v2490_v20, %v2979_v49  ;;  %v520_v4 = vadd.f32 1e-06, %v488_v2  ;;  %v661_v53 = vmul.f32 %v3177_v10, %v585_v44  ;;  %v587_v7 = vmul.f32 %v2490_v20, %v2976_v48 }
 0x10f   : > { %v716_v15 = vpack.c.bf16 %v662_v35, %v660_v30  ;;  %v433_v21 = vpop.xlane.xlu1 %432  ;;  %v489_v29 = vmul.f32 0.00390625, %v430_v55 }
 0x110   : > { %v664_v40 = vmul.f32 %v3182_v9, %v588_v0  ;;  %2501 = vrsqrt.f32 %v520_v4  ;;  %v715_v14 = vpack.c.bf16 %v661_v53, %v659_v8  ;;  %v663_v60 = vmul.f32 %v3177_v10, %v587_v7  ;;  %v436_v48 = vpop.xlane.xlu0 %435 }
 0x111   : > { %v2492_v39 = vpop.eup %2491  ;;  %2503 = vrsqrt.f32 %v519_v38  ;;  %v491_v52 = vmul.f32 0.00390625, %v436_v48 }
 0x112   : > { %v590_v5 = vmul.f32 %v2492_v39, %v2985_v51  ;;  %v490_v51 = vmul.f32 0.00390625, %v433_v21  ;;  %v589_v56 = vmul.f32 %v2492_v39, %v2982_v50  ;;  %v521_v50 = vadd.f32 1e-06, %v489_v29 }
 0x113   : > { %v439_v46 = vpop.xlane.xlu1 %438  ;;  %v523_v0 = vadd.f32 1e-06, %v491_v52 }
 0x114   : > { %v666_v59 = vmul.f32 %v3182_v9, %v590_v5  ;;  %v665_v47 = vmul.f32 %v3177_v10, %v589_v56  ;;  %v492_v54 = vmul.f32 0.00390625, %v439_v46 }
 0x115   : > { %1198 = vmatmul.mubr.bf16.gmra.mxu0 %v711_v13  ;;  %1391 = vmatmul.mubr.bf16.gmra.mxu1 %v711_v13  ;;  %v2494_v19 = vpop.eup %2493 }
 0x116   : > { %1207 = vmatprep.mubr.bf16.mxu0 %v714_v16  ;;  %1400 = vmatprep.mubr.bf16.mxu1 %v714_v16  ;;  %v2496_v49 = vpop.eup %2495  ;;  %v718_v31 = vpack.c.bf16 %v666_v59, %v664_v40  ;;  %v594_v13 = vmul.f32 %v2494_v19, %v2994_v57  ;;  %v522_v16 = vadd.f32 1e-06, %v490_v51  ;;  %v717_v12 = vpack.c.bf16 %v665_v47, %v663_v60 }
 0x117   : > { %v592_v24 = vmul.f32 %v2496_v49, %v2997_v58  ;;  %v591_v6 = vmul.f32 %v2533_v18, %v2496_v49  ;;  %v593_v30 = vmul.f32 %v2534_v28, %v2494_v19  ;;  %v524_v41 = vadd.f32 1e-06, %v492_v54  ;;  %v445_v8 = vpop.xlane.xlu1 %444 }
 0x118   : > { %v670_v58 = vmul.f32 %v3182_v9, %v594_v13  ;;  %2505 = vrsqrt.f32 %v522_v16  ;;  %v494_v38 = vmul.f32 0.00390625, %v445_v8  ;;  %v2535_v13 = vld [vmem:[%s2865_s7 + $0x100] sm:$0xff] }
 0x119   : > { %v2498_v27 = vpop.eup %2497  ;;  %v668_v20 = vmul.f32 %v3182_v9, %v592_v24  ;;  %2507 = vrsqrt.f32 %v521_v50  ;;  %v667_v1 = vmul.f32 %v3177_v10, %v591_v6  ;;  %v669_v44 = vmul.f32 %v3177_v10, %v593_v30 }
 0x11a   : > { %v2500_v57 = vpop.eup %2499  ;;  %v598_v2 = vmul.f32 %v2498_v27, %v3017_v26  ;;  %2509 = vrsqrt.f32 %v524_v41  ;;  %v597_v19 = vmul.f32 %v2498_v27, %v3014_v25 }
 0x11b   : > { %v720_v35 = vpack.c.bf16 %v670_v58, %v668_v20  ;;  %v596_v39 = vmul.f32 %v2500_v57, %v3011_v23  ;;  %v719_v53 = vpack.c.bf16 %v669_v44, %v667_v1  ;;  %v595_v21 = vmul.f32 %v2500_v57, %v3008_v22 }
 0x11c   : > { %v674_v4 = vmul.f32 %v3182_v9, %v598_v2  ;;  %2511 = vrsqrt.f32 %v523_v0  ;;  %v526_v22 = vadd.f32 1e-06, %v494_v38  ;;  %v3632_v38 = vld [vmem:[#allocation13_spill] sm:$0xff] }
 0x11d   : > { %1208 = vmatmul.mubr.bf16.gmra.mxu0 %v713_v11  ;;  %1401 = vmatmul.mubr.bf16.gmra.mxu1 %v713_v11  ;;  %v2502_v11 = vpop.eup %2501  ;;  %v672_v5 = vmul.f32 %v3182_v9, %v596_v39  ;;  %v671_v51 = vmul.f32 %v3177_v10, %v595_v21 }
 0x11e   : > { %1217 = vmatprep.mubr.bf16.mxu0 %v716_v15  ;;  %1410 = vmatprep.mubr.bf16.mxu1 %v716_v15  ;;  %v442_v15 = vpop.xlane.xlu0 %441  ;;  %v2504_v23 = vpop.eup %2503  ;;  %v602_v55 = vmul.f32 %v2502_v11, %v3031_v43  ;;  %v601_v47 = vmul.f32 %v2502_v11, %v3028_v42 }
 0x11f   : > { %v493_v26 = vmul.f32 0.00390625, %v442_v15  ;;  %v722_v40 = vpack.c.bf16 %v674_v4, %v672_v5  ;;  %v600_v59 = vmul.f32 %v2504_v23, %v3021_v33  ;;  %v451_v33 = vpop.xlane.xlu1 %450  ;;  %v599_v60 = vmul.f32 %v2535_v13, %v2504_v23  ;;  %v2536_v23 = vld [vmem:[%s2865_s7 + $0x140] sm:$0xff] }
 0x120   : > { %v678_v29 = vmul.f32 %v3182_v9, %v602_v55  ;;  %v496_v16 = vmul.f32 0.00390625, %v451_v33  ;;  %v677_v57 = vmul.f32 %v3177_v10, %v601_v47  ;;  %v3634_v13 = vld [vmem:[#allocation12_spill] sm:$0xff] }
 0x121   : > { %v525_v49 = vadd.f32 1e-06, %v493_v26  ;;  %v676_v25 = vmul.f32 %v3182_v9, %v600_v59  ;;  %v675_v58 = vmul.f32 %v3177_v10, %v599_v60  ;;  %v3633_v59 = vld [vmem:[#allocation14_spill] sm:$0xff] }
 0x122   : > { %v448_v7 = vpop.xlane.xlu0 %447  ;;  %v528_v54 = vadd.f32 1e-06, %v496_v16 }
 0x123   : > { %2513 = vrsqrt.f32 %v525_v49  ;;  %v495_v43 = vmul.f32 0.00390625, %v448_v7  ;;  %v724_v46 = vpack.c.bf16 %v678_v29, %v676_v25  ;;  %v723_v6 = vpack.c.bf16 %v677_v57, %v675_v58 }
 0x124   : > { %2515 = vrsqrt.f32 %v526_v22 }
 0x125   : > { %1218 = vmatmul.mubr.bf16.gmra.mxu0 %v715_v14  ;;  %1411 = vmatmul.mubr.bf16.gmra.mxu1 %v715_v14  ;;  %v673_v14 = vmul.f32 %v3177_v10, %v597_v19  ;;  %v2506_v56 = vpop.eup %2505  ;;  %v527_v50 = vadd.f32 1e-06, %v495_v43 }
 0x126   : > { %1227 = vmatprep.mubr.bf16.mxu0 %v718_v31  ;;  %1420 = vmatprep.mubr.bf16.mxu1 %v718_v31  ;;  %v2508_v31 = vpop.eup %2507  ;;  %v606_v27 = vmul.f32 %v2506_v56, %v3043_v62  ;;  %v454_v52 = vpop.xlane.xlu0 %453  ;;  %v605_v30 = vmul.f32 %v2506_v56, %v3040_v61 }
 0x127   : > { %v721_v24 = vpack.c.bf16 %v673_v14, %v671_v51  ;;  %v604_v48 = vmul.f32 %v2508_v31, %v3049_v3  ;;  %v2510_v20 = vpop.eup %2509  ;;  %v457_v3 = vpop.xlane.xlu1 %456  ;;  %2517 = vrsqrt.f32 %v527_v50  ;;  %v497_v62 = vmul.f32 0.00390625, %v454_v52  ;;  %v3636_v50 = vld [vmem:[#allocation16_spill] sm:$0xff] }
 0x128   : > { %2519 = vrsqrt.f32 %v528_v54  ;;  %v603_v28 = vmul.f32 %v2508_v31, %v3046_v63  ;;  %v498_v39 = vmul.f32 0.00390625, %v457_v3  ;;  %v610_v41 = vmul.f32 %v2510_v20, %v3071_v45  ;;  %v2537_v31 = vld [vmem:[%s2865_s7 + $0x160] sm:$0xff] }
 0x129   : > { %v680_v42 = vmul.f32 %v3182_v9, %v604_v48  ;;  %v2512_v18 = vpop.eup %2511  ;;  %v529_v11 = vadd.f32 1e-06, %v497_v62  ;;  %v681_v15 = vmul.f32 %v3177_v10, %v605_v30  ;;  %v3635_v48 = vld [vmem:[#allocation17_spill] sm:$0xff]  ;;  %v3637_v30 = vld [vmem:[#allocation15_spill] sm:$0xff] }
 0x12a   : > { %v608_v2 = vmul.f32 %v2512_v18, %v3064_v34  ;;  %v679_v44 = vmul.f32 %v3177_v10, %v603_v28  ;;  %v460_v0 = vpop.xlane.xlu0 %459  ;;  %v530_v63 = vadd.f32 1e-06, %v498_v39  ;;  %v686_v5 = vmul.f32 %v3182_v9, %v610_v41 }
 0x12b   : > { %v463_v34 = vpop.xlane.xlu1 %462  ;;  %2521 = vrsqrt.f32 %v529_v11  ;;  %v499_v45 = vmul.f32 0.00390625, %v460_v0  ;;  %v607_v26 = vmul.f32 %v2536_v23, %v2512_v18  ;;  %v3639_v11 = vld [vmem:[#allocation21_spill] sm:$0xff] }
 0x12c   : > { %v684_v61 = vmul.f32 %v3182_v9, %v608_v2  ;;  %v725_v8 = vpack.c.bf16 %v681_v15, %v679_v44  ;;  %v500_v21 = vmul.f32 0.00390625, %v463_v34  ;;  %2523 = vrsqrt.f32 %v530_v63  ;;  %v3638_v2 = vld [vmem:[#allocation20_spill] sm:$0xff] }
 0x12d   : > { %1228 = vmatmul.mubr.bf16.gmra.mxu0 %v717_v12  ;;  %1421 = vmatmul.mubr.bf16.gmra.mxu1 %v717_v12  ;;  %v682_v12 = vmul.f32 %v3182_v9, %v606_v27  ;;  %v531_v49 = vadd.f32 1e-06, %v499_v45  ;;  %v683_v14 = vmul.f32 %v3177_v10, %v607_v26 }
 0x12e   : > { %1237 = vmatprep.mubr.bf16.mxu0 %v720_v35  ;;  %1430 = vmatprep.mubr.bf16.mxu1 %v720_v35  ;;  %v728_v19 = vpack.c.bf16 %v686_v5, %v684_v61  ;;  %v532_v56 = vadd.f32 1e-06, %v500_v21  ;;  %v466_v33 = vpop.xlane.xlu0 %465 }
 0x12f   : > { %v726_v35 = vpack.c.bf16 %v682_v12, %v680_v42  ;;  %v469_v29 = vpop.xlane.xlu1 %468  ;;  %2525 = vrsqrt.f32 %v531_v49 }
 0x130   : > { %v2514_v1 = vpop.eup %2513  ;;  %2527 = vrsqrt.f32 %v532_v56  ;;  %v502_v47 = vmul.f32 0.00390625, %v469_v29 }
 0x131   : > { %v2516_v4 = vpop.eup %2515  ;;  %v611_v43 = vmul.f32 %v2537_v31, %v2514_v1 }
 0x132   : > { %v614_v55 = vmul.f32 %v2516_v4, %v3633_v59  ;;  %v613_v60 = vmul.f32 %v2516_v4, %v3634_v13  ;;  %v534_v52 = vadd.f32 1e-06, %v502_v47  ;;  %v3640_v4 = vld [vmem:[#allocation18_spill] sm:$0xff]  ;;  %v3646_v47 = vld [vmem:[#allocation25_spill] sm:$0xff] }
 0x133   : > { %v687_v57 = vmul.f32 %v3177_v10, %v611_v43 }
 0x134   : > { %v2518_v51 = vpop.eup %2517  ;;  %v690_v25 = vmul.f32 %v3182_v9, %v614_v55  ;;  %v689_v54 = vmul.f32 %v3177_v10, %v613_v60  ;;  %2529 = vrsqrt.f32 %v534_v52  ;;  %v3645_v60 = vld [vmem:[#allocation24_spill] sm:$0xff] }
 0x135   : > { %1238 = vmatmul.mubr.bf16.gmra.mxu0 %v719_v53  ;;  %1431 = vmatmul.mubr.bf16.gmra.mxu1 %v719_v53  ;;  %v609_v53 = vmul.f32 %v2510_v20, %v3061_v32  ;;  %v2520_v22 = vpop.eup %2519  ;;  %v616_v27 = vmul.f32 %v2518_v51, %v3635_v48 }
 0x136   : > { %1247 = vmatprep.mubr.bf16.mxu0 %v722_v40  ;;  %1440 = vmatprep.mubr.bf16.mxu1 %v722_v40  ;;  %v612_v40 = vmul.f32 %v2514_v1, %v3632_v38  ;;  %v618_v20 = vmul.f32 %v2520_v22, %v3636_v50  ;;  %v729_v62 = vpack.c.bf16 %v689_v54, %v687_v57  ;;  %v3647_v50 = vld [vmem:[#allocation27_spill] sm:$0xff] }
 0x137   : > { %v685_v7 = vmul.f32 %v3177_v10, %v609_v53  ;;  %v692_v12 = vmul.f32 %v3182_v9, %v616_v27  ;;  %v3642_v53 = vld [vmem:[#allocation23_spill] sm:$0xff]  ;;  %v3648_v57 = vsub.s32 0, %v3647_v50 }
 0x138   : > { %v688_v32 = vmul.f32 %v3182_v9, %v612_v40  ;;  %v2522_v58 = vpop.eup %2521  ;;  %v694_v18 = vmul.f32 %v3182_v9, %v618_v20  ;;  %v815_v20 = vsub.s32 2, %v3647_v50 }
 0x139   : > { %v2524_v3 = vpop.eup %2523  ;;  %v620_v41 = vmul.f32 %v2522_v58, %v3638_v2  ;;  %v619_v45 = vmul.f32 %v2522_v58, %v3640_v4  ;;  %v803_v58 = vld [vmem:[%s3577_s3] sm:$0xf] }
 0x13a   : > { %v730_v16 = vpack.c.bf16 %v690_v25, %v688_v32  ;;  %v732_v39 = vpack.c.bf16 %v694_v18, %v692_v12  ;;  %v622_v1 = vmul.f32 %v2524_v3, %v3639_v11  ;;  %v3644_v25 = vld [vmem:[#allocation26_spill] sm:$0xff]  ;;  %v3318_v54 = vrot.slane %v803_v58, %v3648_v57 }
 0x13b   : > { %v696_v61 = vmul.f32 %v3182_v9, %v620_v41  ;;  %v695_v38 = vmul.f32 %v3177_v10, %v619_v45  ;;  %v3320_v52 = vrot.slane %v803_v58, %v815_v20 }
 0x13c   : > { %v2526_v44 = vpop.eup %2525  ;;  %v698_v5 = vmul.f32 %v3182_v9, %v622_v1 }
 0x13d   : > { %1248 = vmatmul.mubr.bf16.gmra.mxu0 %v721_v24  ;;  %1441 = vmatmul.mubr.bf16.gmra.mxu1 %v721_v24  ;;  %v727_v24 = vpack.c.bf16 %v685_v7, %v683_v14  ;;  %v2528_v63 = vpop.eup %2527  ;;  %v624_v21 = vmul.f32 %v2526_v44, %v3642_v53  ;;  %v3643_v7 = vld [vmem:[#allocation22_spill] sm:$0xff] }
 0x13e   : > { %1257 = vmatprep.mubr.bf16.mxu0 %v724_v46  ;;  %1450 = vmatprep.mubr.bf16.mxu1 %v724_v46  ;;  %v501_v46 = vmul.f32 0.00390625, %v466_v33  ;;  %v734_v26 = vpack.c.bf16 %v698_v5, %v696_v61  ;;  %v623_v56 = vmul.f32 %v2526_v44, %v3643_v7 }
 0x13f   : > { %v700_v55 = vmul.f32 %v3182_v9, %v624_v21 }
 0x140   : > { %v533_v42 = vadd.f32 1e-06, %v501_v46  ;;  %v699_v33 = vmul.f32 %v3177_v10, %v623_v56 }
 0x141   : > { %v2530_v59 = vpop.eup %2529 }
 0x142   : > { %2531 = vrsqrt.f32 %v533_v42  ;;  %v630_v29 = vmul.f32 %v2530_v59, %v3644_v25 }
 0x145   : > { %1258 = vmatmul.mubr.bf16.gmra.mxu0 %v723_v6  ;;  %1451 = vmatmul.mubr.bf16.gmra.mxu1 %v723_v6  ;;  %v2538_v6 = vld [vmem:[%s2865_s7 + $0x180] sm:$0xff] }
 0x146   : > { %1267 = vmatprep.mubr.bf16.mxu0 %v726_v35  ;;  %1460 = vmatprep.mubr.bf16.mxu1 %v726_v35  ;;  %v615_v28 = vmul.f32 %v2538_v6, %v2518_v51  ;;  %v617_v35 = vmul.f32 %v2520_v22, %v3637_v30  ;;  %v625_v22 = vmul.f32 %v2528_v63, %v3131_v36 }
 0x148   : > { %v691_v15 = vmul.f32 %v3177_v10, %v615_v28  ;;  %v693_v0 = vmul.f32 %v3177_v10, %v617_v35  ;;  %v701_v31 = vmul.f32 %v3177_v10, %v625_v22 }
 0x14a   : > { %v731_v34 = vpack.c.bf16 %v693_v0, %v691_v15  ;;  %v735_v13 = vpack.c.bf16 %v701_v31, %v699_v33 }
 0x14d   : > { %1268 = vmatmul.mubr.bf16.gmra.mxu0 %v725_v8  ;;  %1461 = vmatmul.mubr.bf16.gmra.mxu1 %v725_v8  ;;  %v3641_v8 = vld [vmem:[#allocation19_spill] sm:$0xff] }
 0x14e   : > { %1277 = vmatprep.mubr.bf16.mxu0 %v728_v19  ;;  %1470 = vmatprep.mubr.bf16.mxu1 %v728_v19  ;;  %v621_v23 = vmul.f32 %v2524_v3, %v3641_v8  ;;  %v626_v19 = vmul.f32 %v2528_v63, %v3134_v37 }
 0x14f   : > { %v2532_v51 = vpop.eup %2531 }
 0x150   : > { %v697_v40 = vmul.f32 %v3177_v10, %v621_v23  ;;  %v702_v49 = vmul.f32 %v3182_v9, %v626_v19  ;;  %v628_v32 = vmul.f32 %v2532_v51, %v3154_v17  ;;  %v627_v36 = vmul.f32 %v2532_v51, %v3645_v60 }
 0x152   : > { %v733_v14 = vpack.c.bf16 %v697_v40, %v695_v38  ;;  %v736_v37 = vpack.c.bf16 %v702_v49, %v700_v55  ;;  %v704_v43 = vmul.f32 %v3182_v9, %v628_v32  ;;  %v703_v46 = vmul.f32 %v3177_v10, %v627_v36 }
 0x155   : > { %1278 = vmatmul.mubr.bf16.gmra.mxu0 %v727_v24  ;;  %1471 = vmatmul.mubr.bf16.gmra.mxu1 %v727_v24  ;;  %v706_v24 = vmul.f32 %v3182_v9, %v630_v29  ;;  %v819_v9 = vsub.s32 3, %v3647_v50 }
 0x156   : > { %1287 = vmatprep.mubr.bf16.mxu0 %v730_v16  ;;  %1480 = vmatprep.mubr.bf16.mxu1 %v730_v16  ;;  %v629_v16 = vmul.f32 %v2530_v59, %v3646_v47 }
 0x157   : > { %v738_v17 = vpack.c.bf16 %v706_v24, %v704_v43  ;;  %v3326_v12 = vrot.slane %v803_v58, %v819_v9 }
 0x158   : > { %v705_v48 = vmul.f32 %v3177_v10, %v629_v16  ;;  %v3649_v10 = vsub.s32 1, %v3647_v50 }
 0x15a   : > { %v737_v27 = vpack.c.bf16 %v705_v48, %v703_v46  ;;  %v3324_v42 = vrot.slane %v803_v58, %v3649_v10 }
 0x15d   : > { %1288 = vmatmul.mubr.bf16.gmra.mxu0 %v729_v62  ;;  %1481 = vmatmul.mubr.bf16.gmra.mxu1 %v729_v62 }
 0x15e   : > { %1297 = vmatprep.mubr.bf16.mxu0 %v732_v39  ;;  %1490 = vmatprep.mubr.bf16.mxu1 %v732_v39 }
 0x165   : > { %1298 = vmatmul.mubr.bf16.gmra.mxu0 %v731_v34  ;;  %1491 = vmatmul.mubr.bf16.gmra.mxu1 %v731_v34 }
 0x166   : > { %1307 = vmatprep.mubr.bf16.mxu0 %v734_v26  ;;  %1500 = vmatprep.mubr.bf16.mxu1 %v734_v26 }
 0x16d   : > { %1308 = vmatmul.mubr.bf16.gmra.mxu0 %v733_v14  ;;  %1501 = vmatmul.mubr.bf16.gmra.mxu1 %v733_v14 }
 0x16e   : > { %1317 = vmatprep.mubr.bf16.mxu0 %v736_v37  ;;  %1510 = vmatprep.mubr.bf16.mxu1 %v736_v37 }
 0x175   : > { %1318 = vmatmul.mubr.bf16.gmra.mxu0 %v735_v13  ;;  %1511 = vmatmul.mubr.bf16.gmra.mxu1 %v735_v13 }
 0x176   : > { %1327 = vmatprep.mubr.bf16.mxu0 %v738_v17  ;;  %1520 = vmatprep.mubr.bf16.mxu1 %v738_v17 }
 0x17d   : > { %1328 = vmatmul.mubr.bf16.gmra.mxu0 %v737_v27  ;;  %1521 = vmatmul.mubr.bf16.gmra.mxu1 %v737_v27 }
 0x1c5   : > { %v1179_v18 = vpop.f32.mrf.mxu0  ;;  %v1372_v3 = vpop.f32.mrf.mxu1 }
 0x1c6   : > { %v1180_v28 = vadd.f32 %v1179_v18, %v3318_v54  ;;  %v1373_v30 = vadd.f32 %v1372_v3, %v3320_v52 }
 0x1c7   : > { %v1181_v62 = vpop.f32.mrf.mxu0  ;;  %v1374_v6 = vpop.f32.mrf.mxu1 }
 0x1c8   : > { %v1182_v35 = vadd.f32 %v1181_v62, %v3324_v42  ;;  %v1375_v39 = vadd.f32 %v1374_v6, %v3326_v12 }
 0x1c9   : > { %v1183_v2 = vpop.f32.mrf.mxu0  ;;  %v1376_v41 = vpop.f32.mrf.mxu1 }
 0x1ca   : > { %v2236_v11 = vpack.c.bf16 %v1182_v35, %v1180_v28  ;;  %v2237_v1 = vpack.c.bf16 %v1375_v39, %v1373_v30  ;;  %v1184_v0 = vadd.f32 %v1183_v2, %v3318_v54  ;;  %v1377_v63 = vadd.f32 %v1376_v41, %v3320_v52 }
 0x1cb   : > { %v1185_v44 = vpop.f32.mrf.mxu0  ;;  %v1378_v15 = vpop.f32.mrf.mxu1 }
 0x1cc   : > { %1915 = vst [vmem:[%s3334_s20] sm:$0xff] %v2236_v11  ;;  %1916 = vst [vmem:[%s3334_s20 + $0x8] sm:$0xff] %v2237_v1  ;;  %v1186_v61 = vadd.f32 %v1185_v44, %v3324_v42  ;;  %v1379_v5 = vadd.f32 %v1378_v15, %v3326_v12 }
 0x1cd   : > { %v1189_v34 = vpop.f32.mrf.mxu0  ;;  %v1382_v4 = vpop.f32.mrf.mxu1 }
 0x1ce   : > { %v2238_v45 = vpack.c.bf16 %v1186_v61, %v1184_v0  ;;  %v2239_v8 = vpack.c.bf16 %v1379_v5, %v1377_v63  ;;  %v1190_v53 = vadd.f32 %v1189_v34, %v3318_v54  ;;  %v1383_v21 = vadd.f32 %v1382_v4, %v3320_v52 }
 0x1cf   : > { %v1191_v23 = vpop.f32.mrf.mxu0  ;;  %v1384_v26 = vpop.f32.mrf.mxu1 }
 0x1d0   : > { %1917 = vst [vmem:[%s3334_s20 + $0x10] sm:$0xff] %v2238_v45  ;;  %1918 = vst [vmem:[%s3334_s20 + $0x18] sm:$0xff] %v2239_v8  ;;  %v1192_v19 = vadd.f32 %v1191_v23, %v3324_v42  ;;  %v1385_v38 = vadd.f32 %v1384_v26, %v3326_v12 }
 0x1d1   : > { %v1193_v40 = vpop.f32.mrf.mxu0  ;;  %v1386_v59 = vpop.f32.mrf.mxu1 }
 0x1d2   : > { %v2240_v55 = vpack.c.bf16 %v1192_v19, %v1190_v53  ;;  %v2241_v49 = vpack.c.bf16 %v1385_v38, %v1383_v21  ;;  %v1194_v7 = vadd.f32 %v1193_v40, %v3318_v54  ;;  %v1387_v56 = vadd.f32 %v1386_v59, %v3320_v52 }
 0x1d3   : > { %v1195_v51 = vpop.f32.mrf.mxu0  ;;  %v1388_v14 = vpop.f32.mrf.mxu1 }
 0x1d4   : > { %1919 = vst [vmem:[%s3334_s20 + $0x20] sm:$0xff] %v2240_v55  ;;  %1920 = vst [vmem:[%s3334_s20 + $0x28] sm:$0xff] %v2241_v49  ;;  %v1196_v22 = vadd.f32 %v1195_v51, %v3324_v42  ;;  %v1389_v37 = vadd.f32 %v1388_v14, %v3326_v12 }
 0x1d5   : > { %v1199_v32 = vpop.f32.mrf.mxu0  ;;  %v1392_v25 = vpop.f32.mrf.mxu1 }
 0x1d6   : > { %v2242_v29 = vpack.c.bf16 %v1196_v22, %v1194_v7  ;;  %v2243_v33 = vpack.c.bf16 %v1389_v37, %v1387_v56  ;;  %v1200_v24 = vadd.f32 %v1199_v32, %v3318_v54  ;;  %v1393_v13 = vadd.f32 %v1392_v25, %v3320_v52 }
 0x1d7   : > { %v1201_v31 = vpop.f32.mrf.mxu0  ;;  %v1394_v43 = vpop.f32.mrf.mxu1 }
 0x1d8   : > { %1921 = vst [vmem:[%s3334_s20 + $0x30] sm:$0xff] %v2242_v29  ;;  %1922 = vst [vmem:[%s3334_s20 + $0x38] sm:$0xff] %v2243_v33  ;;  %v1202_v60 = vadd.f32 %v1201_v31, %v3324_v42  ;;  %v1395_v36 = vadd.f32 %v1394_v43, %v3326_v12 }
 0x1d9   : > { %v1203_v47 = vpop.f32.mrf.mxu0  ;;  %v1396_v16 = vpop.f32.mrf.mxu1 }
 0x1da   : > { %v2244_v17 = vpack.c.bf16 %v1202_v60, %v1200_v24  ;;  %v2245_v46 = vpack.c.bf16 %v1395_v36, %v1393_v13  ;;  %v1204_v50 = vadd.f32 %v1203_v47, %v3318_v54  ;;  %v1397_v20 = vadd.f32 %v1396_v16, %v3320_v52 }
 0x1db   : > { %v1205_v48 = vpop.f32.mrf.mxu0  ;;  %v1398_v27 = vpop.f32.mrf.mxu1 }
 0x1dc   : > { %1923 = vst [vmem:[%s3334_s20 + $0x40] sm:$0xff] %v2244_v17  ;;  %1924 = vst [vmem:[%s3334_s20 + $0x48] sm:$0xff] %v2245_v46  ;;  %v1206_v9 = vadd.f32 %v1205_v48, %v3324_v42  ;;  %v1399_v58 = vadd.f32 %v1398_v27, %v3326_v12 }
 0x1dd   : > { %v1209_v57 = vpop.f32.mrf.mxu0  ;;  %v1402_v10 = vpop.f32.mrf.mxu1 }
 0x1de   : > { %v2246_v18 = vpack.c.bf16 %v1206_v9, %v1204_v50  ;;  %v2247_v3 = vpack.c.bf16 %v1399_v58, %v1397_v20  ;;  %v1210_v28 = vadd.f32 %v1209_v57, %v3318_v54  ;;  %v1403_v30 = vadd.f32 %v1402_v10, %v3320_v52 }
 0x1df   : > { %v1211_v62 = vpop.f32.mrf.mxu0  ;;  %v1404_v6 = vpop.f32.mrf.mxu1 }
 0x1e0   : > { %1925 = vst [vmem:[%s3334_s20 + $0x50] sm:$0xff] %v2246_v18  ;;  %1926 = vst [vmem:[%s3334_s20 + $0x58] sm:$0xff] %v2247_v3  ;;  %v1212_v35 = vadd.f32 %v1211_v62, %v3324_v42  ;;  %v1405_v39 = vadd.f32 %v1404_v6, %v3326_v12 }
 0x1e1   : > { %v1213_v2 = vpop.f32.mrf.mxu0  ;;  %v1406_v41 = vpop.f32.mrf.mxu1 }
 0x1e2   : > { %v2248_v11 = vpack.c.bf16 %v1212_v35, %v1210_v28  ;;  %v2249_v1 = vpack.c.bf16 %v1405_v39, %v1403_v30  ;;  %v1214_v0 = vadd.f32 %v1213_v2, %v3318_v54  ;;  %v1407_v63 = vadd.f32 %v1406_v41, %v3320_v52 }
 0x1e3   : > { %v1215_v44 = vpop.f32.mrf.mxu0  ;;  %v1408_v15 = vpop.f32.mrf.mxu1 }
 0x1e4   : > { %1927 = vst [vmem:[%s3334_s20 + $0x60] sm:$0xff] %v2248_v11  ;;  %1928 = vst [vmem:[%s3334_s20 + $0x68] sm:$0xff] %v2249_v1  ;;  %v1216_v61 = vadd.f32 %v1215_v44, %v3324_v42  ;;  %v1409_v5 = vadd.f32 %v1408_v15, %v3326_v12 }
 0x1e5   : > { %v1219_v34 = vpop.f32.mrf.mxu0  ;;  %v1412_v4 = vpop.f32.mrf.mxu1 }
 0x1e6   : > { %v2250_v45 = vpack.c.bf16 %v1216_v61, %v1214_v0  ;;  %v2251_v8 = vpack.c.bf16 %v1409_v5, %v1407_v63  ;;  %v1220_v53 = vadd.f32 %v1219_v34, %v3318_v54  ;;  %v1413_v21 = vadd.f32 %v1412_v4, %v3320_v52 }
 0x1e7   : > { %v1221_v23 = vpop.f32.mrf.mxu0  ;;  %v1414_v26 = vpop.f32.mrf.mxu1 }
 0x1e8   : > { %1929 = vst [vmem:[%s3334_s20 + $0x70] sm:$0xff] %v2250_v45  ;;  %1930 = vst [vmem:[%s3334_s20 + $0x78] sm:$0xff] %v2251_v8  ;;  %v1222_v19 = vadd.f32 %v1221_v23, %v3324_v42  ;;  %v1415_v38 = vadd.f32 %v1414_v26, %v3326_v12 }
 0x1e9   : > { %v1223_v40 = vpop.f32.mrf.mxu0  ;;  %v1416_v59 = vpop.f32.mrf.mxu1 }
 0x1ea   : > { %v2252_v55 = vpack.c.bf16 %v1222_v19, %v1220_v53  ;;  %v2253_v49 = vpack.c.bf16 %v1415_v38, %v1413_v21  ;;  %v1224_v7 = vadd.f32 %v1223_v40, %v3318_v54  ;;  %v1417_v56 = vadd.f32 %v1416_v59, %v3320_v52 }
 0x1eb   : > { %v1225_v51 = vpop.f32.mrf.mxu0  ;;  %v1418_v14 = vpop.f32.mrf.mxu1 }
 0x1ec   : > { %1931 = vst [vmem:[%s3334_s20 + $0x80] sm:$0xff] %v2252_v55  ;;  %1932 = vst [vmem:[%s3334_s20 + $0x88] sm:$0xff] %v2253_v49  ;;  %v1226_v22 = vadd.f32 %v1225_v51, %v3324_v42  ;;  %v1419_v37 = vadd.f32 %v1418_v14, %v3326_v12 }
 0x1ed   : > { %v1229_v32 = vpop.f32.mrf.mxu0  ;;  %v1422_v25 = vpop.f32.mrf.mxu1 }
 0x1ee   : > { %v2254_v29 = vpack.c.bf16 %v1226_v22, %v1224_v7  ;;  %v2255_v33 = vpack.c.bf16 %v1419_v37, %v1417_v56  ;;  %v1230_v24 = vadd.f32 %v1229_v32, %v3318_v54  ;;  %v1423_v13 = vadd.f32 %v1422_v25, %v3320_v52 }
 0x1ef   : > { %v1231_v31 = vpop.f32.mrf.mxu0  ;;  %v1424_v43 = vpop.f32.mrf.mxu1 }
 0x1f0   : > { %1933 = vst [vmem:[%s3334_s20 + $0x90] sm:$0xff] %v2254_v29  ;;  %1934 = vst [vmem:[%s3334_s20 + $0x98] sm:$0xff] %v2255_v33  ;;  %v1232_v60 = vadd.f32 %v1231_v31, %v3324_v42  ;;  %v1425_v36 = vadd.f32 %v1424_v43, %v3326_v12 }
 0x1f1   : > { %v1233_v47 = vpop.f32.mrf.mxu0  ;;  %v1426_v16 = vpop.f32.mrf.mxu1 }
 0x1f2   : > { %v2256_v17 = vpack.c.bf16 %v1232_v60, %v1230_v24  ;;  %v2257_v46 = vpack.c.bf16 %v1425_v36, %v1423_v13  ;;  %v1234_v50 = vadd.f32 %v1233_v47, %v3318_v54  ;;  %v1427_v20 = vadd.f32 %v1426_v16, %v3320_v52 }
 0x1f3   : > { %v1235_v48 = vpop.f32.mrf.mxu0  ;;  %v1428_v27 = vpop.f32.mrf.mxu1 }
 0x1f4   : > { %1935 = vst [vmem:[%s3334_s20 + $0xa0] sm:$0xff] %v2256_v17  ;;  %1936 = vst [vmem:[%s3334_s20 + $0xa8] sm:$0xff] %v2257_v46  ;;  %v1236_v9 = vadd.f32 %v1235_v48, %v3324_v42  ;;  %v1429_v58 = vadd.f32 %v1428_v27, %v3326_v12 }
 0x1f5   : > { %v1239_v57 = vpop.f32.mrf.mxu0  ;;  %v1432_v10 = vpop.f32.mrf.mxu1 }
 0x1f6   : > { %v2258_v18 = vpack.c.bf16 %v1236_v9, %v1234_v50  ;;  %v2259_v3 = vpack.c.bf16 %v1429_v58, %v1427_v20  ;;  %v1240_v28 = vadd.f32 %v1239_v57, %v3318_v54  ;;  %v1433_v30 = vadd.f32 %v1432_v10, %v3320_v52 }
 0x1f7   : > { %v1241_v62 = vpop.f32.mrf.mxu0  ;;  %v1434_v6 = vpop.f32.mrf.mxu1 }
 0x1f8   : > { %1937 = vst [vmem:[%s3334_s20 + $0xb0] sm:$0xff] %v2258_v18  ;;  %1938 = vst [vmem:[%s3334_s20 + $0xb8] sm:$0xff] %v2259_v3  ;;  %v1242_v35 = vadd.f32 %v1241_v62, %v3324_v42  ;;  %v1435_v39 = vadd.f32 %v1434_v6, %v3326_v12 }
 0x1f9   : > { %v1243_v2 = vpop.f32.mrf.mxu0  ;;  %v1436_v41 = vpop.f32.mrf.mxu1 }
 0x1fa   : > { %v2260_v11 = vpack.c.bf16 %v1242_v35, %v1240_v28  ;;  %v2261_v1 = vpack.c.bf16 %v1435_v39, %v1433_v30  ;;  %v1244_v0 = vadd.f32 %v1243_v2, %v3318_v54  ;;  %v1437_v63 = vadd.f32 %v1436_v41, %v3320_v52 }
 0x1fb   : > { %v1245_v44 = vpop.f32.mrf.mxu0  ;;  %v1438_v15 = vpop.f32.mrf.mxu1 }
 0x1fc   : > { %1939 = vst [vmem:[%s3334_s20 + $0xc0] sm:$0xff] %v2260_v11  ;;  %1940 = vst [vmem:[%s3334_s20 + $0xc8] sm:$0xff] %v2261_v1  ;;  %v1246_v61 = vadd.f32 %v1245_v44, %v3324_v42  ;;  %v1439_v5 = vadd.f32 %v1438_v15, %v3326_v12 }
 0x1fd   : > { %v1249_v34 = vpop.f32.mrf.mxu0  ;;  %v1442_v4 = vpop.f32.mrf.mxu1 }
 0x1fe   : > { %v2262_v45 = vpack.c.bf16 %v1246_v61, %v1244_v0  ;;  %v2263_v8 = vpack.c.bf16 %v1439_v5, %v1437_v63  ;;  %v1250_v53 = vadd.f32 %v1249_v34, %v3318_v54  ;;  %v1443_v21 = vadd.f32 %v1442_v4, %v3320_v52 }
 0x1ff   : > { %v1251_v23 = vpop.f32.mrf.mxu0  ;;  %v1444_v26 = vpop.f32.mrf.mxu1 }
 0x200   : > { %1941 = vst [vmem:[%s3334_s20 + $0xd0] sm:$0xff] %v2262_v45  ;;  %1942 = vst [vmem:[%s3334_s20 + $0xd8] sm:$0xff] %v2263_v8  ;;  %v1252_v19 = vadd.f32 %v1251_v23, %v3324_v42  ;;  %v1445_v38 = vadd.f32 %v1444_v26, %v3326_v12 }
 0x201   : > { %v1253_v40 = vpop.f32.mrf.mxu0  ;;  %v1446_v59 = vpop.f32.mrf.mxu1 }
 0x202   : > { %v2264_v55 = vpack.c.bf16 %v1252_v19, %v1250_v53  ;;  %v2265_v49 = vpack.c.bf16 %v1445_v38, %v1443_v21  ;;  %v1254_v7 = vadd.f32 %v1253_v40, %v3318_v54  ;;  %v1447_v56 = vadd.f32 %v1446_v59, %v3320_v52 }
 0x203   : > { %v1255_v51 = vpop.f32.mrf.mxu0  ;;  %v1448_v14 = vpop.f32.mrf.mxu1 }
 0x204   : > { %1943 = vst [vmem:[%s3334_s20 + $0xe0] sm:$0xff] %v2264_v55  ;;  %1944 = vst [vmem:[%s3334_s20 + $0xe8] sm:$0xff] %v2265_v49  ;;  %v1256_v22 = vadd.f32 %v1255_v51, %v3324_v42  ;;  %v1449_v37 = vadd.f32 %v1448_v14, %v3326_v12 }
 0x205   : > { %v1259_v32 = vpop.f32.mrf.mxu0  ;;  %v1452_v25 = vpop.f32.mrf.mxu1 }
 0x206   : > { %v2266_v29 = vpack.c.bf16 %v1256_v22, %v1254_v7  ;;  %v2267_v33 = vpack.c.bf16 %v1449_v37, %v1447_v56  ;;  %v1260_v24 = vadd.f32 %v1259_v32, %v3318_v54  ;;  %v1453_v13 = vadd.f32 %v1452_v25, %v3320_v52 }
 0x207   : > { %v1261_v31 = vpop.f32.mrf.mxu0  ;;  %v1454_v43 = vpop.f32.mrf.mxu1 }
 0x208   : > { %1945 = vst [vmem:[%s3334_s20 + $0xf0] sm:$0xff] %v2266_v29  ;;  %1946 = vst [vmem:[%s3334_s20 + $0xf8] sm:$0xff] %v2267_v33  ;;  %v1262_v60 = vadd.f32 %v1261_v31, %v3324_v42  ;;  %v1455_v36 = vadd.f32 %v1454_v43, %v3326_v12 }
 0x209   : > { %v1263_v47 = vpop.f32.mrf.mxu0  ;;  %v1456_v16 = vpop.f32.mrf.mxu1 }
 0x20a   : > { %v2268_v17 = vpack.c.bf16 %v1262_v60, %v1260_v24  ;;  %v2269_v46 = vpack.c.bf16 %v1455_v36, %v1453_v13  ;;  %v1264_v50 = vadd.f32 %v1263_v47, %v3318_v54  ;;  %v1457_v20 = vadd.f32 %v1456_v16, %v3320_v52 }
 0x20b   : > { %v1265_v48 = vpop.f32.mrf.mxu0  ;;  %v1458_v27 = vpop.f32.mrf.mxu1 }
 0x20c   : > { %1947 = vst [vmem:[%s3334_s20 + $0x100] sm:$0xff] %v2268_v17  ;;  %1948 = vst [vmem:[%s3334_s20 + $0x108] sm:$0xff] %v2269_v46  ;;  %v1266_v9 = vadd.f32 %v1265_v48, %v3324_v42  ;;  %v1459_v58 = vadd.f32 %v1458_v27, %v3326_v12 }
 0x20d   : > { %v1269_v57 = vpop.f32.mrf.mxu0  ;;  %v1462_v10 = vpop.f32.mrf.mxu1 }
 0x20e   : > { %v2270_v18 = vpack.c.bf16 %v1266_v9, %v1264_v50  ;;  %v2271_v3 = vpack.c.bf16 %v1459_v58, %v1457_v20  ;;  %v1270_v28 = vadd.f32 %v1269_v57, %v3318_v54  ;;  %v1463_v30 = vadd.f32 %v1462_v10, %v3320_v52 }
 0x20f   : > { %v1271_v62 = vpop.f32.mrf.mxu0  ;;  %v1464_v6 = vpop.f32.mrf.mxu1 }
 0x210   : > { %1949 = vst [vmem:[%s3334_s20 + $0x110] sm:$0xff] %v2270_v18  ;;  %1950 = vst [vmem:[%s3334_s20 + $0x118] sm:$0xff] %v2271_v3  ;;  %v1272_v35 = vadd.f32 %v1271_v62, %v3324_v42  ;;  %v1465_v39 = vadd.f32 %v1464_v6, %v3326_v12 }
 0x211   : > { %v1273_v2 = vpop.f32.mrf.mxu0  ;;  %v1466_v41 = vpop.f32.mrf.mxu1 }
 0x212   : > { %v2272_v11 = vpack.c.bf16 %v1272_v35, %v1270_v28  ;;  %v2273_v1 = vpack.c.bf16 %v1465_v39, %v1463_v30  ;;  %v1274_v0 = vadd.f32 %v1273_v2, %v3318_v54  ;;  %v1467_v63 = vadd.f32 %v1466_v41, %v3320_v52 }
 0x213   : > { %v1275_v44 = vpop.f32.mrf.mxu0  ;;  %v1468_v15 = vpop.f32.mrf.mxu1 }
 0x214   : > { %1951 = vst [vmem:[%s3334_s20 + $0x120] sm:$0xff] %v2272_v11  ;;  %1952 = vst [vmem:[%s3334_s20 + $0x128] sm:$0xff] %v2273_v1  ;;  %v1276_v61 = vadd.f32 %v1275_v44, %v3324_v42  ;;  %v1469_v5 = vadd.f32 %v1468_v15, %v3326_v12 }
 0x215   : > { %v1279_v34 = vpop.f32.mrf.mxu0  ;;  %v1472_v4 = vpop.f32.mrf.mxu1 }
 0x216   : > { %v2274_v45 = vpack.c.bf16 %v1276_v61, %v1274_v0  ;;  %v2275_v8 = vpack.c.bf16 %v1469_v5, %v1467_v63  ;;  %v1280_v53 = vadd.f32 %v1279_v34, %v3318_v54  ;;  %v1473_v21 = vadd.f32 %v1472_v4, %v3320_v52 }
 0x217   : > { %v1281_v23 = vpop.f32.mrf.mxu0  ;;  %v1474_v26 = vpop.f32.mrf.mxu1 }
 0x218   : > { %1953 = vst [vmem:[%s3334_s20 + $0x130] sm:$0xff] %v2274_v45  ;;  %1954 = vst [vmem:[%s3334_s20 + $0x138] sm:$0xff] %v2275_v8  ;;  %v1282_v19 = vadd.f32 %v1281_v23, %v3324_v42  ;;  %v1475_v38 = vadd.f32 %v1474_v26, %v3326_v12 }
 0x219   : > { %v1283_v40 = vpop.f32.mrf.mxu0  ;;  %v1476_v59 = vpop.f32.mrf.mxu1 }
 0x21a   : > { %v2276_v55 = vpack.c.bf16 %v1282_v19, %v1280_v53  ;;  %v2277_v49 = vpack.c.bf16 %v1475_v38, %v1473_v21  ;;  %v1284_v7 = vadd.f32 %v1283_v40, %v3318_v54  ;;  %v1477_v56 = vadd.f32 %v1476_v59, %v3320_v52 }
 0x21b   : > { %v1285_v51 = vpop.f32.mrf.mxu0  ;;  %v1478_v14 = vpop.f32.mrf.mxu1 }
 0x21c   : > { %1955 = vst [vmem:[%s3334_s20 + $0x140] sm:$0xff] %v2276_v55  ;;  %1956 = vst [vmem:[%s3334_s20 + $0x148] sm:$0xff] %v2277_v49  ;;  %v1286_v22 = vadd.f32 %v1285_v51, %v3324_v42  ;;  %v1479_v37 = vadd.f32 %v1478_v14, %v3326_v12 }
 0x21d   : > { %v1289_v32 = vpop.f32.mrf.mxu0  ;;  %v1482_v25 = vpop.f32.mrf.mxu1 }
 0x21e   : > { %v2278_v29 = vpack.c.bf16 %v1286_v22, %v1284_v7  ;;  %v2279_v33 = vpack.c.bf16 %v1479_v37, %v1477_v56  ;;  %v1290_v24 = vadd.f32 %v1289_v32, %v3318_v54  ;;  %v1483_v13 = vadd.f32 %v1482_v25, %v3320_v52 }
 0x21f   : > { %v1291_v31 = vpop.f32.mrf.mxu0  ;;  %v1484_v43 = vpop.f32.mrf.mxu1 }
 0x220   : > { %1957 = vst [vmem:[%s3334_s20 + $0x150] sm:$0xff] %v2278_v29  ;;  %1958 = vst [vmem:[%s3334_s20 + $0x158] sm:$0xff] %v2279_v33  ;;  %v1292_v60 = vadd.f32 %v1291_v31, %v3324_v42  ;;  %v1485_v36 = vadd.f32 %v1484_v43, %v3326_v12 }
 0x221   : > { %v1293_v47 = vpop.f32.mrf.mxu0  ;;  %v1486_v16 = vpop.f32.mrf.mxu1 }
 0x222   : > { %v2280_v17 = vpack.c.bf16 %v1292_v60, %v1290_v24  ;;  %v2281_v46 = vpack.c.bf16 %v1485_v36, %v1483_v13  ;;  %v1294_v50 = vadd.f32 %v1293_v47, %v3318_v54  ;;  %v1487_v20 = vadd.f32 %v1486_v16, %v3320_v52 }
 0x223   : > { %v1295_v48 = vpop.f32.mrf.mxu0  ;;  %v1488_v27 = vpop.f32.mrf.mxu1 }
 0x224   : > { %1959 = vst [vmem:[%s3334_s20 + $0x160] sm:$0xff] %v2280_v17  ;;  %1960 = vst [vmem:[%s3334_s20 + $0x168] sm:$0xff] %v2281_v46  ;;  %v1296_v9 = vadd.f32 %v1295_v48, %v3324_v42  ;;  %v1489_v58 = vadd.f32 %v1488_v27, %v3326_v12 }
 0x225   : > { %v1299_v57 = vpop.f32.mrf.mxu0  ;;  %v1492_v10 = vpop.f32.mrf.mxu1 }
 0x226   : > { %v2282_v18 = vpack.c.bf16 %v1296_v9, %v1294_v50  ;;  %v2283_v3 = vpack.c.bf16 %v1489_v58, %v1487_v20  ;;  %v1300_v28 = vadd.f32 %v1299_v57, %v3318_v54  ;;  %v1493_v30 = vadd.f32 %v1492_v10, %v3320_v52 }
 0x227   : > { %v1301_v62 = vpop.f32.mrf.mxu0  ;;  %v1494_v6 = vpop.f32.mrf.mxu1 }
 0x228   : > { %1961 = vst [vmem:[%s3334_s20 + $0x170] sm:$0xff] %v2282_v18  ;;  %1962 = vst [vmem:[%s3334_s20 + $0x178] sm:$0xff] %v2283_v3  ;;  %v1302_v35 = vadd.f32 %v1301_v62, %v3324_v42  ;;  %v1495_v39 = vadd.f32 %v1494_v6, %v3326_v12 }
 0x229   : > { %v1303_v2 = vpop.f32.mrf.mxu0  ;;  %v1496_v41 = vpop.f32.mrf.mxu1 }
 0x22a   : > { %v2284_v11 = vpack.c.bf16 %v1302_v35, %v1300_v28  ;;  %v2285_v1 = vpack.c.bf16 %v1495_v39, %v1493_v30  ;;  %v1304_v0 = vadd.f32 %v1303_v2, %v3318_v54  ;;  %v1497_v63 = vadd.f32 %v1496_v41, %v3320_v52 }
 0x22b   : > { %v1305_v44 = vpop.f32.mrf.mxu0  ;;  %v1498_v15 = vpop.f32.mrf.mxu1 }
 0x22c   : > { %1963 = vst [vmem:[%s3334_s20 + $0x180] sm:$0xff] %v2284_v11  ;;  %1964 = vst [vmem:[%s3334_s20 + $0x188] sm:$0xff] %v2285_v1  ;;  %v1306_v61 = vadd.f32 %v1305_v44, %v3324_v42  ;;  %v1499_v5 = vadd.f32 %v1498_v15, %v3326_v12 }
 0x22d   : > { %v1309_v34 = vpop.f32.mrf.mxu0  ;;  %v1502_v4 = vpop.f32.mrf.mxu1 }
 0x22e   : > { %v2286_v45 = vpack.c.bf16 %v1306_v61, %v1304_v0  ;;  %v2287_v8 = vpack.c.bf16 %v1499_v5, %v1497_v63  ;;  %v1310_v53 = vadd.f32 %v1309_v34, %v3318_v54  ;;  %v1503_v21 = vadd.f32 %v1502_v4, %v3320_v52 }
 0x22f   : > { %v1311_v23 = vpop.f32.mrf.mxu0  ;;  %v1504_v26 = vpop.f32.mrf.mxu1 }
 0x230   : > { %1965 = vst [vmem:[%s3334_s20 + $0x190] sm:$0xff] %v2286_v45  ;;  %1966 = vst [vmem:[%s3334_s20 + $0x198] sm:$0xff] %v2287_v8  ;;  %v1312_v19 = vadd.f32 %v1311_v23, %v3324_v42  ;;  %v1505_v38 = vadd.f32 %v1504_v26, %v3326_v12 }
 0x231   : > { %v1313_v40 = vpop.f32.mrf.mxu0  ;;  %v1506_v59 = vpop.f32.mrf.mxu1 }
 0x232   : > { %v2288_v55 = vpack.c.bf16 %v1312_v19, %v1310_v53  ;;  %v2289_v49 = vpack.c.bf16 %v1505_v38, %v1503_v21  ;;  %v1314_v7 = vadd.f32 %v1313_v40, %v3318_v54  ;;  %v1507_v56 = vadd.f32 %v1506_v59, %v3320_v52 }
 0x233   : > { %v1315_v51 = vpop.f32.mrf.mxu0  ;;  %v1508_v14 = vpop.f32.mrf.mxu1 }
 0x234   : > { %1967 = vst [vmem:[%s3334_s20 + $0x1a0] sm:$0xff] %v2288_v55  ;;  %1968 = vst [vmem:[%s3334_s20 + $0x1a8] sm:$0xff] %v2289_v49  ;;  %v1316_v22 = vadd.f32 %v1315_v51, %v3324_v42  ;;  %v1509_v37 = vadd.f32 %v1508_v14, %v3326_v12 }
 0x235   : > { %v1319_v32 = vpop.f32.mrf.mxu0  ;;  %v1512_v25 = vpop.f32.mrf.mxu1 }
 0x236   : > { %v2290_v29 = vpack.c.bf16 %v1316_v22, %v1314_v7  ;;  %v2291_v33 = vpack.c.bf16 %v1509_v37, %v1507_v56  ;;  %v1320_v24 = vadd.f32 %v1319_v32, %v3318_v54  ;;  %v1513_v13 = vadd.f32 %v1512_v25, %v3320_v52 }
 0x237   : > { %v1321_v31 = vpop.f32.mrf.mxu0  ;;  %v1514_v43 = vpop.f32.mrf.mxu1 }
 0x238   : > { %1969 = vst [vmem:[%s3334_s20 + $0x1b0] sm:$0xff] %v2290_v29  ;;  %1970 = vst [vmem:[%s3334_s20 + $0x1b8] sm:$0xff] %v2291_v33  ;;  %v1322_v60 = vadd.f32 %v1321_v31, %v3324_v42  ;;  %v1515_v36 = vadd.f32 %v1514_v43, %v3326_v12 }
 0x239   : > { %v1323_v47 = vpop.f32.mrf.mxu0  ;;  %v1516_v16 = vpop.f32.mrf.mxu1 }
 0x23a   : > { %v2292_v17 = vpack.c.bf16 %v1322_v60, %v1320_v24  ;;  %v2293_v46 = vpack.c.bf16 %v1515_v36, %v1513_v13  ;;  %v1324_v50 = vadd.f32 %v1323_v47, %v3318_v54  ;;  %v1517_v20 = vadd.f32 %v1516_v16, %v3320_v52 }
 0x23b   : > { %v1325_v48 = vpop.f32.mrf.mxu0  ;;  %v1518_v27 = vpop.f32.mrf.mxu1 }
 0x23c   : > { %1971 = vst [vmem:[%s3334_s20 + $0x1c0] sm:$0xff] %v2292_v17  ;;  %1972 = vst [vmem:[%s3334_s20 + $0x1c8] sm:$0xff] %v2293_v46  ;;  %v1326_v9 = vadd.f32 %v1325_v48, %v3324_v42  ;;  %v1519_v58 = vadd.f32 %v1518_v27, %v3326_v12 }
 0x23d   : > { %v1329_v57 = vpop.f32.mrf.mxu0  ;;  %v1522_v10 = vpop.f32.mrf.mxu1 }
 0x23e   : > { %v2294_v18 = vpack.c.bf16 %v1326_v9, %v1324_v50  ;;  %v2295_v3 = vpack.c.bf16 %v1519_v58, %v1517_v20  ;;  %v1330_v28 = vadd.f32 %v1329_v57, %v3318_v54  ;;  %v1523_v30 = vadd.f32 %v1522_v10, %v3320_v52 }
 0x23f   : > { %v1331_v62 = vpop.f32.mrf.mxu0  ;;  %v1524_v6 = vpop.f32.mrf.mxu1 }
 0x240   : > { %1973 = vst [vmem:[%s3334_s20 + $0x1d0] sm:$0xff] %v2294_v18  ;;  %1974 = vst [vmem:[%s3334_s20 + $0x1d8] sm:$0xff] %v2295_v3  ;;  %v1332_v35 = vadd.f32 %v1331_v62, %v3324_v42  ;;  %v1525_v39 = vadd.f32 %v1524_v6, %v3326_v12 }
 0x241   : > { %v1333_v2 = vpop.f32.mrf.mxu0  ;;  %v1526_v41 = vpop.f32.mrf.mxu1 }
 0x242   : > { %v2296_v11 = vpack.c.bf16 %v1332_v35, %v1330_v28  ;;  %v2297_v1 = vpack.c.bf16 %v1525_v39, %v1523_v30  ;;  %v1334_v0 = vadd.f32 %v1333_v2, %v3318_v54  ;;  %v1527_v63 = vadd.f32 %v1526_v41, %v3320_v52 }
 0x243   : > { %v1335_v44 = vpop.f32.mrf.mxu0  ;;  %v1528_v15 = vpop.f32.mrf.mxu1 }
 0x244   : > { %1975 = vst [vmem:[%s3334_s20 + $0x1e0] sm:$0xff] %v2296_v11  ;;  %1976 = vst [vmem:[%s3334_s20 + $0x1e8] sm:$0xff] %v2297_v1  ;;  %v1336_v61 = vadd.f32 %v1335_v44, %v3324_v42  ;;  %v1529_v5 = vadd.f32 %v1528_v15, %v3326_v12 }
 0x246   : > { %v2298_v34 = vpack.c.bf16 %v1336_v61, %v1334_v0  ;;  %v2299_v4 = vpack.c.bf16 %v1529_v5, %v1527_v63 }
 0x248   : > { %1977 = vst [vmem:[%s3334_s20 + $0x1f0] sm:$0xff] %v2298_v34  ;;  %1978 = vst [vmem:[%s3334_s20 + $0x1f8] sm:$0xff] %v2299_v4 }
 0x249   : > { %2632 = shalt.err (!%p2629_p12)
}
 0x24a   : > { %s2633_s10 = scalar_lea.hbm %s3527_s25, 8192  ;;  %s2637_s23 = scalar_lea.hbm %s3578_s4, 16384 }
 0x24b   : > { %p2634_p6 = scmp.ne.s32.totalorder %s3527_s25, %s2633_s10  ;;  %p2638_p13 = scmp.lt.s32.totalorder %s3527_s25, %s3578_s4 }
 0x24c   : > { %p2639_p3 = scmp.lt.s32.totalorder %s2637_s23, %s2633_s10 }
 0x24d   : > { %p2635_p7 = pnand %p2634_p6, %p3650_p0 }
 0x24e   : > { %p2640_p8 = por %p2639_p3, %p2638_p13 }
 0x24f   : > { %p2636_p11 = pneg %p2635_p7 }
 0x251   : > { %p2641_p2 = pnand %p2640_p8, %p2636_p11 }
 0x253   : > { %2644 = shalt.err (!%p2641_p2)
}
 0x254   : > { %s2695_s29 = smov 256   ;;  %s2696_s20 = smov 16  }
 0x255   : > { %2312 = dma.vmem_to_hbm [thread:$0]  (%p3650_p0), %s3529_s11, 8192, %s3527_s25, %s1980_s19, %s2695_s29, %s2695_s29, %s2696_s20  }
 0x256 PF: > { %s2009_s22 = sand.u32 1, %s2675_s15   ;;  %p3651_p4 = scmp.ne.s32.totalorder %s3606_s28, 0 }
 0x257   : > { %p3652_p5 = scmp.ge.s32.totalorder %s2687_s18, 2  ;;  %s2010_s14 = scalar_lea.sflag [#allocation4], %s2009_s22 }
 0x259   : > { %p2326_p9 = pnand %p3652_p5, %p3651_p4 }
 0x25b   : > { %p2327_p10 = pneg %p2326_p9 }
 0x25d   : > { %2670 = dma.done.wait (%p2327_p10), %s2010_s14, 8192  }
 0x25e   : > { %2672 = vsyncadd (%p2327_p10), %s2010_s14, 4294959104  ;;  %p18_p1 = scmp.ge.s32.totalorder %s2747_s21, 4   ;;  %s3653_s15 = smov %s2679_s16 }
 0x25f   : > { %s3654_s16 = smov %s2683_s17  ;;  %s3655_s17 = smov %s2759_s24 }
 0x260   : > { %s3656_s18 = smov %s2747_s21  ;;  %20 = sbr.rel (!%p18_p1) target bundleno = 8 (0x8), region = 89 }
 0x265   :  { %2015 = vsyncpa [#allocation3], 1 }
 0x266   :  { %2017 = vsyncpa [#allocation3 + $0x1], 1 }
 0x267   :  { %2018 = vsyncpa [#allocation6], 1 }
 0x268   :  { %2019 = vsyncpa [#allocation4], 1 }
 0x269   :  { %2021 = vsyncpa [#allocation4 + $0x1], 1 }

</bundles_post_ra>
